<compile_context>
chip_gen: v7x
topology: tpu7x:2x2x1
jax: 0.10.0
libtpu: 0.0.40
codegen_flags: <defaults>
</compile_context>

<pallas_src>
import jax
import jax.numpy as jnp
from jax import lax
from jax.experimental import pallas as pl
from jax.experimental.pallas import tpu as pltpu


def _down_conv_relu_kernel(x_ref, w_ref, b_ref, o_ref):
    # x_ref : (1, TD, s*Ho, s, Wo, s*Cin)  input slab, channels-last, taps interleaved
    #         dim2 flattens (kd, ho), dim3 = kh, dim5 flattens (kw, ci)
    # w_ref : (s, s, Cout, s*Cin)          weight regrouped per (kd, kh) tap
    # b_ref : (Cout, 1)                    bias (f32)
    # o_ref : (1, Cout, TD*Ho*Wo)          lane-dense output tile
    s = w_ref.shape[0]
    cout = w_ref.shape[2]
    sc = w_ref.shape[3]
    td = x_ref.shape[1]
    ho = x_ref.shape[2] // s
    wo = x_ref.shape[4]
    rows = td * ho * wo

    acc = jnp.zeros((cout, rows), dtype=jnp.float32)
    # s*s = 4 taps for stride 2: small static unroll (good for the LLO scheduler).
    for kd in range(s):
        for kh in range(s):
            # Static contiguous slice on dim2 selects kd; static int on dim3 selects kh.
            xt = x_ref[0, :, kd * ho:(kd + 1) * ho, kh, :, :]   # (TD, Ho, Wo, s*Cin)
            xt = xt.reshape(rows, sc)                           # rows = (td, ho, wo)
            # (Cout, s*Cin) x (rows, s*Cin)^T -> (Cout, rows): big `rows` on lanes.
            acc = acc + lax.dot_general(
                w_ref[kd, kh], xt,
                dimension_numbers=(((1,), (1,)), ((), ())),
                preferred_element_type=jnp.float32)
    y = acc + b_ref[...]                                        # (Cout,1) broadcasts
    o_ref[0] = jnp.maximum(y, 0.0).astype(o_ref.dtype)


def _choose_depth_tile(N, Do, Ho, Wo, s, cin, cout, in_itemsize,
                       vmem_budget_bytes=12 * 1024 * 1024, target_rows=512):
    """Pick TD = number of output-depth slices per grid step.

    Constraints:
      * TD divides Do                      -> exact grid, no ragged remainder
      * TD*Ho*Wo % 128 == 0 (or TD == Do)  -> lane-dense unmasked output stores
      * double-buffered input+output blocks fit a conservative VMEM budget
        (safe under the scoped default on v5e/v6e/v7x; no vmem_limit needed)
    Preferences: rows around 512+ to amortize ~0.35us/step grid overhead, and
    at least 2 parallel grid steps so both v7x TensorCores get work.
    """
    rows_per_d = Ho * Wo
    pad_sub = -(-Wo // 8) * 8                     # sublane padding of input tile
    pad_lane = -(-(s * cin) // 128) * 128         # lane padding of input tile
    in_bytes_per_d = (s * Ho) * s * pad_sub * pad_lane * in_itemsize
    out_bytes_per_d = (-(-cout // 8) * 8) * rows_per_d * 4

    def ok(td):
        if Do % td:
            return False
        if td != Do and (td * rows_per_d) % 128:
            return False
        return 2 * td * (in_bytes_per_d + out_bytes_per_d) <= vmem_budget_bytes

    cands = [td for td in range(1, Do + 1) if ok(td)]
    if not cands:
        return Do
    multi = [td for td in cands if N * (Do // td) >= 2]   # keep 2 TCs busy (v7x)
    pool = multi if multi else cands
    capped = [td for td in pool
              if td * rows_per_d <= max(8 * target_rows, rows_per_d)]
    pool = capped if capped else pool
    return max(pool)


def downsampling_con_block(x_ndhwc, weight, bias, stride=2):
    """Conv3d(kernel=stride, stride=stride, padding=0) + ReLU.

    x_ndhwc: (N, D, H, W, Cin)  channels-last (the block's external layout;
             keeping NDHWC end-to-end avoids any HBM relayout of activations)
    weight : (Cout, Cin, s, s, s)  PyTorch Conv3d layout
    bias   : (Cout,)
    returns: (N, Cout, D//s, H//s, W//s)  NCDHW (matches the PyTorch module)
    """
    N, D, H, W, Cin = x_ndhwc.shape
    s = int(stride)
    Cout = weight.shape[0]
    assert weight.shape == (Cout, Cin, s, s, s)
    assert D % s == 0 and H % s == 0 and W % s == 0
    Do, Ho, Wo = D // s, H // s, W // s

    TD = _choose_depth_tile(N, Do, Ho, Wo, s, Cin, Cout, x_ndhwc.dtype.itemsize)
    rows = TD * Ho * Wo

    # Free (metadata-only) view of x: (N, Do, (kd,ho), kh, wo, (kw,ci)).
    x6 = x_ndhwc.reshape(N, Do, s * Ho, s, Wo, s * Cin)

    # Tiny weight re-layout (Cout*Cin*s^3 elements): (co,ci,kd,kh,kw) -> (kd,kh,co,(kw,ci)).
    w_r = jnp.transpose(weight, (2, 3, 0, 4, 1)).reshape(s, s, Cout, s * Cin)
    w_r = w_r.astype(x_ndhwc.dtype)
    b2 = bias.reshape(Cout, 1).astype(jnp.float32)

    grid = (N, Do // TD)
    out3 = pl.pallas_call(
        _down_conv_relu_kernel,
        out_shape=jax.ShapeDtypeStruct((N, Cout, Do * Ho * Wo), x_ndhwc.dtype),
        grid_spec=pltpu.PrefetchScalarGridSpec(
            num_scalar_prefetch=0,
            grid=grid,
            in_specs=[
                # One fully contiguous input slab per step (DMA reads each byte once).
                pl.BlockSpec((1, TD, s * Ho, s, Wo, s * Cin),
                             lambda n, d: (n, d, 0, 0, 0, 0)),
                # Weight / bias: constant block index -> held resident across the grid.
                pl.BlockSpec((s, s, Cout, s * Cin), lambda n, d: (0, 0, 0, 0)),
                pl.BlockSpec((Cout, 1), lambda n, d: (0, 0)),
            ],
            # Lane-dense output tile: last dim = TD*Ho*Wo (multiple of 128).
            out_specs=pl.BlockSpec((1, Cout, rows), lambda n, d: (n, 0, d)),
        ),
        compiler_params=pltpu.CompilerParams(
            dimension_semantics=("parallel", "parallel")),
    )(x6, w_r, b2)

    # Free reshape: already in NCDHW order, no output transpose needed.
    return out3.reshape(N, Cout, Do, Ho, Wo)


def downsampling_con_block_ncdhw(x, weight, bias, stride=2):
    """Drop-in NCDHW wrapper (PyTorch layout).  In a channels-last network the
    transpose below disappears; it is the only non-free layout op in the path."""
    x_ndhwc = jnp.transpose(x, (0, 2, 3, 4, 1))
    return downsampling_con_block(x_ndhwc, weight, bias, stride=stride)


def _reference_ncdhw(x, weight, bias, stride=2):
    # Independent pure-JAX reference of Conv3d(k=s, stride=s, pad=0) + ReLU.
    N, Cin, D, H, W = x.shape
    s = stride
    xr = x.reshape(N, Cin, D // s, s, H // s, s, W // s, s)
    y = jnp.einsum('ncdihjwk,ocijk->nodhw', xr, weight)
    y = y + bias[None, :, None, None, None]
    return jnp.maximum(y, 0.0)


if __name__ == "__main__":
    key = jax.random.PRNGKey(0)
    k_x, k_w, k_b = jax.random.split(key, 3)

    N, Cin, Cout = 2, 8, 16
    D = H = W = 16
    stride = 2

    x_ncdhw = jax.random.normal(k_x, (N, Cin, D, H, W), dtype=jnp.float32)

    # PyTorch-style uniform init, bound = 1/sqrt(fan_in) = 1/sqrt(Cin*s^3).
    bound = 1.0 / (Cin * stride ** 3) ** 0.5
    weight = jax.random.uniform(k_w, (Cout, Cin, stride, stride, stride),
                                dtype=jnp.float32, minval=-bound, maxval=bound)
    bias = jax.random.uniform(k_b, (Cout,), dtype=jnp.float32,
                              minval=-bound, maxval=bound)

    out = downsampling_con_block_ncdhw(x_ncdhw, weight, bias, stride=stride)
    out = jax.block_until_ready(out)

    ref = _reference_ncdhw(x_ncdhw, weight, bias, stride=stride)
    assert out.shape == (N, Cout, D // stride, H // stride, W // stride)
    assert jnp.allclose(out, ref, atol=1e-4, rtol=1e-4), \
        f"max|diff|={float(jnp.max(jnp.abs(out - ref)))}"

    print("KERNEL_OK")
</pallas_src>

<mosaic_0001>
module attributes {stable_mosaic.version = 11 : i64} {
  func.func @_down_conv_relu_kernel(%arg0: i32, %arg1: i32, %arg2: memref<1x8x16x2x8x16xf32, #tpu.memory_space<vmem>>, %arg3: memref<2x2x16x16xf32, #tpu.memory_space<vmem>>, %arg4: memref<16x1xf32, #tpu.memory_space<vmem>>, %arg5: memref<1x16x512xf32, #tpu.memory_space<vmem>>) attributes {dimension_semantics = [#tpu.dimension_semantics<parallel>, #tpu.dimension_semantics<parallel>], iteration_bounds = array<i64: 2, 1>, scalar_prefetch = 0 : i64, scratch_operands = 0 : i64, tpu.core_type = #tpu.core_type<tc>, window_params = [{transform_indices = @transform_0, window_bounds = array<i64: 1, 8, 16, 2, 8, 16>}, {pipeline_mode = #tpu.pipeline_mode<synchronous>, transform_indices = @transform_1, window_bounds = array<i64: 2, 2, 16, 16>}, {pipeline_mode = #tpu.pipeline_mode<synchronous>, transform_indices = @transform_2, window_bounds = array<i64: 16, 1>}, {transform_indices = @transform_3, window_bounds = array<i64: 1, 16, 512>}]} {
    %cst = arith.constant 0.000000e+00 : f32
    %0 = vector.broadcast %cst : f32 to vector<16x512xf32>
    %c0 = arith.constant 0 : index
    %c0_0 = arith.constant 0 : index
    %c0_1 = arith.constant 0 : index
    %c0_2 = arith.constant 0 : index
    %c0_3 = arith.constant 0 : index
    %c0_4 = arith.constant 0 : index
    %1 = vector.load %arg2[%c0, %c0_0, %c0_1, %c0_2, %c0_3, %c0_4] : memref<1x8x16x2x8x16xf32, #tpu.memory_space<vmem>>, vector<1x8x8x1x8x16xf32>
    %2 = vector.shape_cast %1 : vector<1x8x8x1x8x16xf32> to vector<8x8x8x16xf32>
    %3 = vector.shape_cast %2 : vector<8x8x8x16xf32> to vector<512x16xf32>
    %c0_5 = arith.constant 0 : index
    %c0_6 = arith.constant 0 : index
    %c0_7 = arith.constant 0 : index
    %c0_8 = arith.constant 0 : index
    %4 = vector.load %arg3[%c0_5, %c0_6, %c0_7, %c0_8] : memref<2x2x16x16xf32, #tpu.memory_space<vmem>>, vector<1x1x16x16xf32>
    %5 = vector.shape_cast %4 : vector<1x1x16x16xf32> to vector<16x16xf32>
    %cst_9 = arith.constant dense<0.000000e+00> : vector<16x512xf32>
    %6 = tpu.matmul %5, %3, %cst_9 {dimension_numbers = #tpu.dot_dimension_numbers<[1], [1], [0], [0], [0, 0, 1, 0], [], []>} : vector<16x16xf32>, vector<512x16xf32>, vector<16x512xf32> -> vector<16x512xf32>
    %7 = arith.addf %0, %6 : vector<16x512xf32>
    %c0_10 = arith.constant 0 : index
    %c0_11 = arith.constant 0 : index
    %c0_12 = arith.constant 0 : index
    %c1 = arith.constant 1 : index
    %c0_13 = arith.constant 0 : index
    %c0_14 = arith.constant 0 : index
    %8 = vector.load %arg2[%c0_10, %c0_11, %c0_12, %c1, %c0_13, %c0_14] : memref<1x8x16x2x8x16xf32, #tpu.memory_space<vmem>>, vector<1x8x8x1x8x16xf32>
    %9 = vector.shape_cast %8 : vector<1x8x8x1x8x16xf32> to vector<8x8x8x16xf32>
    %10 = vector.shape_cast %9 : vector<8x8x8x16xf32> to vector<512x16xf32>
    %c0_15 = arith.constant 0 : index
    %c1_16 = arith.constant 1 : index
    %c0_17 = arith.constant 0 : index
    %c0_18 = arith.constant 0 : index
    %11 = vector.load %arg3[%c0_15, %c1_16, %c0_17, %c0_18] : memref<2x2x16x16xf32, #tpu.memory_space<vmem>>, vector<1x1x16x16xf32>
    %12 = vector.shape_cast %11 : vector<1x1x16x16xf32> to vector<16x16xf32>
    %cst_19 = arith.constant dense<0.000000e+00> : vector<16x512xf32>
    %13 = tpu.matmul %12, %10, %cst_19 {dimension_numbers = #tpu.dot_dimension_numbers<[1], [1], [0], [0], [0, 0, 1, 0], [], []>} : vector<16x16xf32>, vector<512x16xf32>, vector<16x512xf32> -> vector<16x512xf32>
    %14 = arith.addf %7, %13 : vector<16x512xf32>
    %c0_20 = arith.constant 0 : index
    %c0_21 = arith.constant 0 : index
    %c8 = arith.constant 8 : index
    %c0_22 = arith.constant 0 : index
    %c0_23 = arith.constant 0 : index
    %c0_24 = arith.constant 0 : index
    %15 = vector.load %arg2[%c0_20, %c0_21, %c8, %c0_22, %c0_23, %c0_24] : memref<1x8x16x2x8x16xf32, #tpu.memory_space<vmem>>, vector<1x8x8x1x8x16xf32>
    %16 = vector.shape_cast %15 : vector<1x8x8x1x8x16xf32> to vector<8x8x8x16xf32>
    %17 = vector.shape_cast %16 : vector<8x8x8x16xf32> to vector<512x16xf32>
    %c1_25 = arith.constant 1 : index
    %c0_26 = arith.constant 0 : index
    %c0_27 = arith.constant 0 : index
    %c0_28 = arith.constant 0 : index
    %18 = vector.load %arg3[%c1_25, %c0_26, %c0_27, %c0_28] : memref<2x2x16x16xf32, #tpu.memory_space<vmem>>, vector<1x1x16x16xf32>
    %19 = vector.shape_cast %18 : vector<1x1x16x16xf32> to vector<16x16xf32>
    %cst_29 = arith.constant dense<0.000000e+00> : vector<16x512xf32>
    %20 = tpu.matmul %19, %17, %cst_29 {dimension_numbers = #tpu.dot_dimension_numbers<[1], [1], [0], [0], [0, 0, 1, 0], [], []>} : vector<16x16xf32>, vector<512x16xf32>, vector<16x512xf32> -> vector<16x512xf32>
    %21 = arith.addf %14, %20 : vector<16x512xf32>
    %c0_30 = arith.constant 0 : index
    %c0_31 = arith.constant 0 : index
    %c8_32 = arith.constant 8 : index
    %c1_33 = arith.constant 1 : index
    %c0_34 = arith.constant 0 : index
    %c0_35 = arith.constant 0 : index
    %22 = vector.load %arg2[%c0_30, %c0_31, %c8_32, %c1_33, %c0_34, %c0_35] : memref<1x8x16x2x8x16xf32, #tpu.memory_space<vmem>>, vector<1x8x8x1x8x16xf32>
    %23 = vector.shape_cast %22 : vector<1x8x8x1x8x16xf32> to vector<8x8x8x16xf32>
    %24 = vector.shape_cast %23 : vector<8x8x8x16xf32> to vector<512x16xf32>
    %c1_36 = arith.constant 1 : index
    %c1_37 = arith.constant 1 : index
    %c0_38 = arith.constant 0 : index
    %c0_39 = arith.constant 0 : index
    %25 = vector.load %arg3[%c1_36, %c1_37, %c0_38, %c0_39] : memref<2x2x16x16xf32, #tpu.memory_space<vmem>>, vector<1x1x16x16xf32>
    %26 = vector.shape_cast %25 : vector<1x1x16x16xf32> to vector<16x16xf32>
    %cst_40 = arith.constant dense<0.000000e+00> : vector<16x512xf32>
    %27 = tpu.matmul %26, %24, %cst_40 {dimension_numbers = #tpu.dot_dimension_numbers<[1], [1], [0], [0], [0, 0, 1, 0], [], []>} : vector<16x16xf32>, vector<512x16xf32>, vector<16x512xf32> -> vector<16x512xf32>
    %28 = arith.addf %21, %27 : vector<16x512xf32>
    %c0_41 = arith.constant 0 : index
    %c0_42 = arith.constant 0 : index
    %29 = vector.load %arg4[%c0_41, %c0_42] : memref<16x1xf32, #tpu.memory_space<vmem>>, vector<16x1xf32>
    %30 = vector.broadcast %29 : vector<16x1xf32> to vector<16x512xf32>
    %31 = arith.addf %28, %30 : vector<16x512xf32>
    %cst_43 = arith.constant 0.000000e+00 : f32
    %32 = vector.broadcast %cst_43 : f32 to vector<16x512xf32>
    %33 = arith.maximumf %31, %32 : vector<16x512xf32>
    %c0_44 = arith.constant 0 : index
    %c0_45 = arith.constant 0 : index
    %c0_46 = arith.constant 0 : index
    %34 = vector.load %arg5[%c0_44, %c0_45, %c0_46] : memref<1x16x512xf32, #tpu.memory_space<vmem>>, vector<1x16x512xf32>
    %35 = vector.shape_cast %34 : vector<1x16x512xf32> to vector<16x512xf32>
    %36 = vector.shape_cast %33 : vector<16x512xf32> to vector<1x16x512xf32>
    tpu.vector_store %arg5[%c0_44, %c0_45, %c0_46], %36 {strides = array<i32>} : memref<1x16x512xf32, #tpu.memory_space<vmem>>, vector<1x16x512xf32>,
    return
  }
  func.func @transform_0(%arg0: i32, %arg1: i32) -> (i32, i32, i32, i32, i32, i32) {
    %c0_i32 = arith.constant 0 : i32
    %c0_i32_0 = arith.constant 0 : i32
    %c0_i32_1 = arith.constant 0 : i32
    %c0_i32_2 = arith.constant 0 : i32
    %c0_i32_3 = arith.constant 0 : i32
    return %arg0, %arg1, %c0_i32, %c0_i32_0, %c0_i32_1, %c0_i32_2 : i32, i32, i32, i32, i32, i32
  }
  func.func @transform_1(%arg0: i32, %arg1: i32) -> (i32, i32, i32, i32) {
    %c0_i32 = arith.constant 0 : i32
    %c0_i32_0 = arith.constant 0 : i32
    %c0_i32_1 = arith.constant 0 : i32
    %c0_i32_2 = arith.constant 0 : i32
    %c0_i32_3 = arith.constant 0 : i32
    return %c0_i32, %c0_i32_0, %c0_i32_1, %c0_i32_2 : i32, i32, i32, i32
  }
  func.func @transform_2(%arg0: i32, %arg1: i32) -> (i32, i32) {
    %c0_i32 = arith.constant 0 : i32
    %c0_i32_0 = arith.constant 0 : i32
    %c0_i32_1 = arith.constant 0 : i32
    return %c0_i32, %c0_i32_0 : i32, i32
  }
  func.func @transform_3(%arg0: i32, %arg1: i32) -> (i32, i32, i32) {
    %c0_i32 = arith.constant 0 : i32
    %c0_i32_0 = arith.constant 0 : i32
    return %arg0, %c0_i32, %arg1 : i32, i32, i32
  }
}

</mosaic_0001>

<bundles_post_ra>
// kernel: tpu_custom_call.1
= control target key start
LH: loop header
LB: loop body
LE: loop exit
PB: predicated region body
PF: predicated region fallthrough
CT: control target
= control target key end

     0   :  { %8 = vsyncpa [#allocation3], 0  ;;  %s4309_s0 = inlined_call_operand.hbm [shape: f32[2,8,16,2,8,16], index: 0, kind: input, shape index: {}]   ;;  %s4310_s1 = inlined_call_operand.hbm [shape: f32[2,2,16,16], index: 1, kind: input, shape index: {}]   ;;  %s4311_s2 = inlined_call_operand.vmem [shape: f32[16,1], index: 2, kind: input, shape index: {}]   ;;  %s4312_s3 = inlined_call_operand.hbm [shape: f32[2,16,512], index: 3, kind: output, shape index: {}]  }
   0x1   :  { %10 = vsyncpa [#allocation3 + $0x1], 0 }
   0x2   :  { %11 = vsyncpa [#allocation6], 0 }
   0x3   :  { %12 = vsyncpa [#allocation4], 0 }
   0x4   :  { %14 = vsyncpa [#allocation4 + $0x1], 0  ;;  %s3501_s12 = smov 0   ;;  %s3503_s13 = smov 0  }
   0x5   :  { %s3505_s14 = smov 0   ;;  %s3507_s15 = smov 0  }
   0x6   :  { %s3509_s16 = smov 0   ;;  %s3511_s17 = smov 0  }
   0x7 LB: > { %s2069_s18 = sadd.s32 4294967295, %s3471_s17   ;;  %s2070_s19 = sadd.s32 4294967294, %s3471_s17   ;;  %s3471_s17 = sphi %s3511_s17, %s20_s17   ;;  %s3467_s16 = sphi %s3509_s16, %s4338_s16   ;;  %s3463_s15 = sphi %s3507_s15, %s4337_s15   ;;  %s3459_s14 = sphi %s3505_s14, %s4336_s14   ;;  %s3455_s13 = sphi %s3503_s13, %s4335_s13   ;;  %s3451_s12 = sphi %s3501_s12, %s4334_s12  }
   0x8   : > { %p54_p0 = scmp.ne.s32.totalorder %s3455_s13, %s3451_s12  ;;  %p3535_p1 = scmp.eq.s32.totalorder %s2069_s18, 0 }
   0x9   : > { %p3539_p2 = scmp.eq.s32.totalorder %s2069_s18, 1  ;;  %p128_p3 = scmp.eq.s32.totalorder %s2070_s19, 1 }
   0xa   : > { %s4317_s20 = scalar_select %p3535_p1, 1, 0 }
   0xb   : > { %s4318_s21 = scalar_select %p3539_p2, 1, 0 }
   0xc   : > { %p3545_p4 = por %p3535_p1, %p54_p0  ;;  %p2071_p5 = scmp.ge.s32.totalorder %s3471_s17, 1 }
   0xd   : > { %p3550_p6 = por %p128_p3, %p54_p0  ;;  %p135_p7 = scmp.lt.s32.totalorder %s3471_s17, 3 }
   0xe   : > { %s4319_s22 = scalar_select %p3545_p4, 1, 0 }
   0xf   : > { %s4320_s23 = scalar_select %p3550_p6, 1, 0 }
  0x10   : > { %p3555_p8 = pnand %p2071_p5, %p135_p7  ;;  %s3473_s25 = smov [#allocation5]  }
  0x11   : > { %s147_s26 = sshll.u32 %s3473_s25, 4  ;;  %s32_s28 = sadd.s32 1, %s3467_s16  ;;  %s148_s26 = int_to_ptr.vmem [resolvable:$true] %s147_s26 }
  0x12   : > { %s4321_s24 = scalar_select %p3555_p8, 1, 0 }
  0x13   : > { %p3256_p9 = pneg %p3555_p8  ;;  %s3327_s4 = scalar_lea.hbm %s4310_s1, 1024 }
  0x14   : > { %p3328_p12 = scmp.ne.s32.totalorder %s4310_s1, %s3327_s4  ;;  %p3334_p5 = scmp.lt.u32.totalorder %s3327_s4, %s4310_s1 }
  0x15   : > { %p3564_p11 = pnand %p3256_p9, %p3535_p1 }
  0x17   : > { %p3329_p13 = pneg %p3564_p11 }
  0x19   : > { %p3330_p0 = pnand %p3329_p13, %p3328_p12 }
  0x1b   : > { %p3331_p3 = pneg %p3330_p0 }
  0x1d   : > { %p3336_p7 = pnand %p3334_p5, %p3331_p3 }
  0x1f   : > { %3339 = shalt.err (!%p3336_p7)
}
  0x20   : > { %s3340_s9 = scalar_lea.vmem %s148_s26, 1024  ;;  %p3348_p1 = scmp.lt.s32.totalorder %s148_s26, %s148_s26 }
  0x21   : > { %p3341_p9 = scmp.ne.s32.totalorder %s148_s26, %s3340_s9  ;;  %p3349_p4 = scmp.lt.s32.totalorder %s3340_s9, %s3340_s9 }
  0x23   : > { %p3343_p10 = pnand %p3341_p9, %p3329_p13  ;;  %p3350_p8 = por %p3349_p4, %p3348_p1 }
  0x25   : > { %p3344_p6 = pneg %p3343_p10 }
  0x27   : > { %p3351_p2 = pnand %p3350_p8, %p3344_p6 }
  0x29   : > { %3354 = shalt.err (!%p3351_p2)
}
  0x2a   : > { %s3474_s10 = smov 128   ;;  %s3475_s11 = smov 8  }
  0x2b   : > { %3259 = dma.hbm_to_vmem [thread:$0]  (!%p3564_p11), %s4310_s1, 1024, %s148_s26, [#allocation6], %s3474_s10, %s3474_s10, %s3475_s11  }
  0x2c   : > { %p34_p1 = scmp.ge.s32.totalorder %s32_s28, 2  ;;  %s41_s25 = sadd.s32 1, %s3459_s14 }
  0x2d   : > { %p48_p2 = scmp.ne.s32.totalorder %s3459_s14, %s3455_s13  ;;  %p49_p4 = scmp.eq.s32.totalorder %s3471_s17, 0 }
  0x2e   : > { %s4340_s28 = smov (%p34_p1, %s32_s28), 0  ;;  %p4324_p8 = scmp.ne.s32.totalorder %s4318_s21, 0 }
  0x2f   : > { %p3594_p6 = por %p49_p4, %p48_p2  ;;  %s36_s30 = ssub.s32 %s3467_s16, %s4340_s28 }
  0x30   : > { %p3600_p10 = por %p4324_p8, %p48_p2  ;;  %p3269_p12 = scmp.lt.s32.totalorder %s3471_s17, 2 }
  0x31   : > { %p39_p11 = scmp.eq.s32.totalorder %s36_s30, 0  ;;  %s164_s26 = sand.u32 1, %s3459_s14  }
  0x32   : > { %s2074_s4 = sshll.u32 %s164_s26, 11  ;;  %s2550_s6 = sshll.u32 %s3467_s16, 15 }
  0x33   : > { %s3609_s5 = scalar_select %p39_p11, %s3459_s14, %s41_s25  }
  0x34   : > { %s3615_s9 = scalar_lea.hbm %s4309_s0, %s2550_s6  ;;  %s168_s21 = scalar_lea.vmem [#allocation2], %s2074_s4 }
  0x35   : > { %s178_s18 = sshll.u32 %s168_s21, 4  ;;  %p3621_p13 = pnand %p3269_p12, %p3594_p6  ;;  %s3617_s18 = int_to_ptr.vmem [resolvable:$true] %s178_s18 }
  0x36   : > { %s3625_s25 = scalar_lea.sflag [#allocation3], %s164_s26  ;;  %s3355_s30 = scalar_lea.hbm %s3615_s9, 32768 }
  0x37   : > { %p3356_p0 = scmp.ne.s32.totalorder %s3615_s9, %s3355_s30  ;;  %p3357_p3 = pneg %p3621_p13 }
  0x38   : > { %s3360_s29 = scalar_lea.hbm %s4309_s0, 65536  ;;  %p3361_p9 = scmp.lt.u32.totalorder %s3615_s9, %s4309_s0 }
  0x39   : > { %p3358_p5 = pnand %p3357_p3, %p3356_p0  ;;  %p3362_p1 = scmp.lt.u32.totalorder %s3360_s29, %s3355_s30 }
  0x3a   : > { %p3364_p4 = scmp.lt.u32.totalorder %s3355_s30, %s3615_s9 }
  0x3b   : > { %p3359_p7 = pneg %p3358_p5  ;;  %p3363_p2 = por %p3362_p1, %p3361_p9 }
  0x3d   : > { %p3365_p6 = por %p3364_p4, %p3363_p2 }
  0x3f   : > { %p3366_p8 = pnand %p3365_p6, %p3359_p7 }
  0x41   : > { %3369 = shalt.err (!%p3366_p8)
}
  0x42   : > { %s3370_s26 = scalar_lea.vmem %s3617_s18, 32768  ;;  %s3476_s21 = smov [#allocation2]  }
  0x43   : > { %p3371_p12 = scmp.ne.s32.totalorder %s3617_s18, %s3370_s26  ;;  %s3375_s4 = sshll.u32 %s3476_s21, 4  ;;  %s3376_s4 = int_to_ptr.vmem [resolvable:$false] %s3375_s4 }
  0x44   : > { %s3377_s6 = scalar_lea.vmem %s3376_s4, 65536  ;;  %p3378_p5 = scmp.lt.s32.totalorder %s3617_s18, %s3376_s4 }
  0x45   : > { %p3373_p11 = pnand %p3371_p12, %p3357_p3  ;;  %p3379_p9 = scmp.lt.s32.totalorder %s3377_s6, %s3370_s26 }
  0x47   : > { %p3374_p0 = pneg %p3373_p11  ;;  %p3380_p1 = por %p3379_p9, %p3378_p5 }
  0x49   : > { %p3381_p2 = pnand %p3380_p1, %p3374_p0 }
  0x4b   : > { %3384 = shalt.err (!%p3381_p2)
}
  0x4c   : > { %3263 = dma.hbm_to_vmem [thread:$0]  (!%p3621_p13), %s3615_s9, 32768, %s3617_s18, %s3625_s25, %s3474_s10, %s3474_s10, %s3475_s11  }
  0x4d   : > { %p4327_p3 = scmp.ne.s32.totalorder %s4321_s24, 0 }
  0x4e   : > { %s3659_s30 = sand.u32 (!%p4327_p3), 1, %s3455_s13   ;;  %p4328_p7 = scmp.ne.s32.totalorder (!%p4327_p3), %s4319_s22, 0 }
  0x4f   : > { %190 = sbr.rel (%p4327_p3) target bundleno = 587 (0x24b), region = 32  ;;  %s2078_s29 = sshll.u32 (!%p4327_p3), %s3659_s30, 11 }
  0x50   : > { %s193_s7 = scalar_lea.sflag (!%p4327_p3), [#allocation3], %s3659_s30  ;;  %s3663_s8 = scalar_lea.vmem (!%p4327_p3), [#allocation2], %s2078_s29 }
  0x56   : > { %3438 = dma.done.wait (%p4328_p7), %s193_s7, 32768  }
  0x57   : > { %3440 = vsyncadd (%p4328_p7), %s193_s7, 4294934528  ;;  %p4329_p13 = scmp.ne.s32.totalorder %s4317_s20, 0 }
  0x59   : > { %3442 = dma.done.wait (%p4329_p13), [#allocation6], 1024  }
  0x5a   : > { %3444 = vsyncadd (%p4329_p13), [#allocation6], 4294966272  ;;  %vm359_vm0 = vcmask 130048   ;;  %v2097_v1 = vld [vmem:[%s3663_s8 + $0x208] sm:$0xff]  ;;  %v2098_v2 = vld [vmem:[%s3663_s8 + $0x218] sm:$0xff]  ;;  %s2080_s11 = sshll.u32 %s3659_s30, 6 }
  0x5b   : > { %vm3675_vm1 = vmpackc.low %vm359_vm0, %vm359_vm0  ;;  %v2129_v3 = vld [vmem:[%s3663_s8 + $0x608] sm:$0xff]  ;;  %v2840_v4 = vpack.c.bf16 %v2098_v2, %v2097_v1  ;;  %v2130_v5 = vld [vmem:[%s3663_s8 + $0x618] sm:$0xff]  ;;  %s222_s9 = scalar_lea.vmem [#allocation7], %s2080_s11  ;;  %s2551_s19 = sshll.u32 %s3463_s15, 10 }
  0x5c   : > { %v2081_v6 = vld [vmem:[%s3663_s8 + $0x8] sm:$0xff]  ;;  %v2082_v7 = vld [vmem:[%s3663_s8 + $0x18] sm:$0xff]  ;;  %v2888_v8 = vpack.c.bf16 %v2130_v5, %v2129_v3  ;;  %v3736_v46 = vld [vmem:[#allocation5 + $0x10] sm:$0xff]  ;;  %s1972_s18 = sshll.u32 %s222_s9, 4  ;;  %s4260_s15 = scalar_lea.hbm %s4312_s3, %s2551_s19  ;;  %s4255_s18 = int_to_ptr.vmem [resolvable:$true] %s1972_s18 }
  0x5d   : > { %v2843_v9 = vpack.c.bf16 %v2082_v7, %v2081_v6  ;;  %v2113_v10 = vld [vmem:[%s3663_s8 + $0x408] sm:$0xff]  ;;  %v2114_v11 = vld [vmem:[%s3663_s8 + $0x418] sm:$0xff]  ;;  %2842 = vmatprep.subr.msk.bf16.mxu0 %vm3675_vm1, %v2840_v4  ;;  %2584 = vmatprep.mubr.msk.f32.mxu0 %vm359_vm0, %v3736_v46  ;;  %s1957_s21 = scalar_lea.sflag [#allocation4], %s3659_s30  ;;  %s3385_s4 = scalar_lea.vmem %s4255_s18, 1024 }
  0x5e   : > { %v2099_v12 = vld [vmem:[%s3663_s8 + $0x228] sm:$0xff]  ;;  %v2891_v13 = vpack.c.bf16 %v2114_v11, %v2113_v10  ;;  %v2100_v14 = vld [vmem:[%s3663_s8 + $0x238] sm:$0xff]  ;;  %2890 = vmatprep.subr.msk.bf16.mxu1 %vm3675_vm1, %v2888_v8  ;;  %2620 = vmatprep.mubr.msk.f32.mxu1 %vm359_vm0, %v3736_v46  ;;  %p3386_p4 = scmp.ne.s32.totalorder %s4255_s18, %s3385_s4  ;;  %s3478_s6 = smov [#allocation7]  }
  0x5f   : > { %v2131_v15 = vld [vmem:[%s3663_s8 + $0x628] sm:$0xff]  ;;  %v2132_v16 = vld [vmem:[%s3663_s8 + $0x638] sm:$0xff]  ;;  %2845 = vmatpush3.bf16.xpose.msk.msra.mxu0 %vm3675_vm1, %v2843_v9  ;;  %v2846_v17 = vpack.c.bf16 %v2100_v14, %v2099_v12  ;;  %s3389_s29 = sshll.u32 %s3478_s6, 4  ;;  %s3390_s29 = int_to_ptr.vmem [resolvable:$false] %s3389_s29 }
  0x60   : > { %v2894_v18 = vpack.c.bf16 %v2132_v16, %v2131_v15  ;;  %2893 = vmatpush3.bf16.xpose.msk.msra.mxu1 %vm3675_vm1, %v2891_v13  ;;  %v2083_v19 = vld [vmem:[%s3663_s8 + $0x28] sm:$0xff]  ;;  %v2084_v20 = vld [vmem:[%s3663_s8 + $0x38] sm:$0xff]  ;;  %p3387_p6 = pnand %p3386_p4, %p3600_p10  ;;  %s3391_s7 = scalar_lea.vmem %s3390_s29, 2048 }
  0x61   : > { %v2115_v21 = vld [vmem:[%s3663_s8 + $0x428] sm:$0xff]  ;;  %2848 = vmatprep.subr.msk.bf16.mxu0 %vm3675_vm1, %v2846_v17  ;;  %v2116_v22 = vld [vmem:[%s3663_s8 + $0x438] sm:$0xff]  ;;  %v2849_v27 = vpack.c.bf16 %v2084_v20, %v2083_v19  ;;  %p3392_p12 = scmp.lt.s32.totalorder %s4255_s18, %s3390_s29  ;;  %p3393_p11 = scmp.lt.s32.totalorder %s3391_s7, %s3385_s4 }
  0x62   : > { %2896 = vmatprep.subr.msk.bf16.mxu1 %vm3675_vm1, %v2894_v18  ;;  %v2101_v23 = vld [vmem:[%s3663_s8 + $0x248] sm:$0xff]  ;;  %v2102_v24 = vld [vmem:[%s3663_s8 + $0x258] sm:$0xff]  ;;  %v2897_v28 = vpack.c.bf16 %v2116_v22, %v2115_v21  ;;  %p3388_p8 = pneg %p3387_p6 }
  0x63   : > { %v2133_v25 = vld [vmem:[%s3663_s8 + $0x648] sm:$0xff]  ;;  %v2134_v26 = vld [vmem:[%s3663_s8 + $0x658] sm:$0xff]  ;;  %v2852_v29 = vpack.c.bf16 %v2102_v24, %v2101_v23  ;;  %p3394_p0 = por %p3393_p11, %p3392_p12 }
  0x64   : > { %v2900_v30 = vpack.c.bf16 %v2134_v26, %v2133_v25  ;;  %v2085_v31 = vld [vmem:[%s3663_s8 + $0x48] sm:$0xff]  ;;  %v2086_v32 = vld [vmem:[%s3663_s8 + $0x58] sm:$0xff] }
  0x65   : > { %v2117_v33 = vld [vmem:[%s3663_s8 + $0x448] sm:$0xff]  ;;  %v2118_v34 = vld [vmem:[%s3663_s8 + $0x458] sm:$0xff]  ;;  %v2855_v39 = vpack.c.bf16 %v2086_v32, %v2085_v31  ;;  %p3395_p5 = pnand %p3394_p0, %p3388_p8 }
  0x66   : > { %v2103_v35 = vld [vmem:[%s3663_s8 + $0x268] sm:$0xff]  ;;  %v2104_v36 = vld [vmem:[%s3663_s8 + $0x278] sm:$0xff]  ;;  %v2903_v40 = vpack.c.bf16 %v2118_v34, %v2117_v33  ;;  %v241_v33 = vld [vmem:[%s3663_s8 + $0x200] sm:$0xff] }
  0x67   : > { %2851 = vmatpush3.bf16.xpose.msk.msra.mxu0 %vm3675_vm1, %v2849_v27  ;;  %v2135_v37 = vld [vmem:[%s3663_s8 + $0x668] sm:$0xff]  ;;  %v2136_v38 = vld [vmem:[%s3663_s8 + $0x678] sm:$0xff]  ;;  %v2858_v41 = vpack.c.bf16 %v2104_v36, %v2103_v35  ;;  %v242_v34 = vld [vmem:[%s3663_s8 + $0x210] sm:$0xff] }
  0x68   : > { %2899 = vmatpush3.bf16.xpose.msk.msra.mxu1 %vm3675_vm1, %v2897_v28  ;;  %2854 = vmatprep.subr.msk.bf16.mxu0 %vm3675_vm1, %v2852_v29  ;;  %v2906_v42 = vpack.c.bf16 %v2136_v38, %v2135_v37  ;;  %v2087_v43 = vld [vmem:[%s3663_s8 + $0x68] sm:$0xff]  ;;  %v2088_v44 = vld [vmem:[%s3663_s8 + $0x78] sm:$0xff]  ;;  %v273_v35 = vld [vmem:[%s3663_s8 + $0x600] sm:$0xff] }
  0x69   : > { %2902 = vmatprep.subr.msk.bf16.mxu1 %vm3675_vm1, %v2900_v30  ;;  %v2119_v45 = vld [vmem:[%s3663_s8 + $0x468] sm:$0xff]  ;;  %v2120_v47 = vld [vmem:[%s3663_s8 + $0x478] sm:$0xff]  ;;  %v2861_v52 = vpack.c.bf16 %v2088_v44, %v2087_v43  ;;  %v274_v36 = vld [vmem:[%s3663_s8 + $0x610] sm:$0xff] }
  0x6a   : > { %v2105_v48 = vld [vmem:[%s3663_s8 + $0x308] sm:$0xff]  ;;  %v2106_v49 = vld [vmem:[%s3663_s8 + $0x318] sm:$0xff]  ;;  %v2909_v53 = vpack.c.bf16 %v2120_v47, %v2119_v45  ;;  %v257_v43 = vld [vmem:[%s3663_s8 + $0x400] sm:$0xff] }
  0x6b   : > { %v2137_v50 = vld [vmem:[%s3663_s8 + $0x708] sm:$0xff]  ;;  %v2138_v51 = vld [vmem:[%s3663_s8 + $0x718] sm:$0xff]  ;;  %v2864_v54 = vpack.c.bf16 %v2106_v49, %v2105_v48  ;;  %v258_v44 = vld [vmem:[%s3663_s8 + $0x410] sm:$0xff] }
  0x6c   : > { %v2912_v55 = vpack.c.bf16 %v2138_v51, %v2137_v50  ;;  %v2089_v56 = vld [vmem:[%s3663_s8 + $0x108] sm:$0xff]  ;;  %v2090_v57 = vld [vmem:[%s3663_s8 + $0x118] sm:$0xff]  ;;  %v243_v45 = vld [vmem:[%s3663_s8 + $0x220] sm:$0xff]  ;;  %v2987_v51 = vpack.c.bf16 %v258_v44, %v257_v43 }
  0x6d   : > { %v2121_v58 = vld [vmem:[%s3663_s8 + $0x508] sm:$0xff]  ;;  %v2122_v59 = vld [vmem:[%s3663_s8 + $0x518] sm:$0xff]  ;;  %v2867_v1 = vpack.c.bf16 %v2090_v57, %v2089_v56  ;;  %v244_v47 = vld [vmem:[%s3663_s8 + $0x230] sm:$0xff] }
  0x6e   : > { %v2107_v60 = vld [vmem:[%s3663_s8 + $0x328] sm:$0xff]  ;;  %v2108_v61 = vld [vmem:[%s3663_s8 + $0x338] sm:$0xff]  ;;  %v2915_v2 = vpack.c.bf16 %v2122_v59, %v2121_v58  ;;  %v275_v48 = vld [vmem:[%s3663_s8 + $0x620] sm:$0xff] }
  0x6f   : > { %2857 = vmatpush3.bf16.xpose.msk.msra.mxu0 %vm3675_vm1, %v2855_v39  ;;  %v2139_v62 = vld [vmem:[%s3663_s8 + $0x728] sm:$0xff]  ;;  %v2140_v63 = vld [vmem:[%s3663_s8 + $0x738] sm:$0xff]  ;;  %v2870_v3 = vpack.c.bf16 %v2108_v61, %v2107_v60  ;;  %v2936_v39 = vpack.c.bf16 %v242_v34, %v241_v33  ;;  %v276_v49 = vld [vmem:[%s3663_s8 + $0x630] sm:$0xff] }
  0x70   : > { %2905 = vmatpush3.bf16.xpose.msk.msra.mxu1 %vm3675_vm1, %v2903_v40  ;;  %2860 = vmatprep.subr.msk.bf16.mxu0 %vm3675_vm1, %v2858_v41  ;;  %v2918_v4 = vpack.c.bf16 %v2140_v63, %v2139_v62  ;;  %v2091_v5 = vld [vmem:[%s3663_s8 + $0x128] sm:$0xff]  ;;  %v2092_v6 = vld [vmem:[%s3663_s8 + $0x138] sm:$0xff]  ;;  %v2984_v40 = vpack.c.bf16 %v274_v36, %v273_v35  ;;  %v225_v41 = vld [vmem:[%s3663_s8] sm:$0xff] }
  0x71   : > { %2908 = vmatprep.subr.msk.bf16.mxu1 %vm3675_vm1, %v2906_v42  ;;  %v2123_v7 = vld [vmem:[%s3663_s8 + $0x528] sm:$0xff]  ;;  %v2124_v8 = vld [vmem:[%s3663_s8 + $0x538] sm:$0xff]  ;;  %v2873_v13 = vpack.c.bf16 %v2092_v6, %v2091_v5  ;;  %v226_v42 = vld [vmem:[%s3663_s8 + $0x10] sm:$0xff] }
  0x72   : > { %v2109_v9 = vld [vmem:[%s3663_s8 + $0x348] sm:$0xff]  ;;  %v2110_v10 = vld [vmem:[%s3663_s8 + $0x358] sm:$0xff]  ;;  %v2921_v14 = vpack.c.bf16 %v2124_v8, %v2123_v7  ;;  %v2939_v50 = vpack.c.bf16 %v226_v42, %v225_v41  ;;  %v228_v56 = vld [vmem:[%s3663_s8 + $0x30] sm:$0xff] }
  0x73   : > { %v2141_v11 = vld [vmem:[%s3663_s8 + $0x748] sm:$0xff]  ;;  %v2142_v12 = vld [vmem:[%s3663_s8 + $0x758] sm:$0xff]  ;;  %v2876_v15 = vpack.c.bf16 %v2110_v10, %v2109_v9  ;;  %v259_v57 = vld [vmem:[%s3663_s8 + $0x420] sm:$0xff] }
  0x74   : > { %v2924_v16 = vpack.c.bf16 %v2142_v12, %v2141_v11  ;;  %v2093_v17 = vld [vmem:[%s3663_s8 + $0x148] sm:$0xff]  ;;  %v2094_v18 = vld [vmem:[%s3663_s8 + $0x158] sm:$0xff]  ;;  %v3842_v58 = vld [vmem:[#allocation5] sm:$0xff] }
  0x75   : > { %v2125_v19 = vld [vmem:[%s3663_s8 + $0x548] sm:$0xff]  ;;  %v2126_v20 = vld [vmem:[%s3663_s8 + $0x558] sm:$0xff]  ;;  %v2879_v25 = vpack.c.bf16 %v2094_v18, %v2093_v17  ;;  %v260_v59 = vld [vmem:[%s3663_s8 + $0x430] sm:$0xff] }
  0x76   : > { %v2111_v21 = vld [vmem:[%s3663_s8 + $0x368] sm:$0xff]  ;;  %v2112_v22 = vld [vmem:[%s3663_s8 + $0x378] sm:$0xff]  ;;  %v2927_v26 = vpack.c.bf16 %v2126_v20, %v2125_v19  ;;  %v245_v60 = vld [vmem:[%s3663_s8 + $0x240] sm:$0xff] }
  0x77   : > { %2863 = vmatpush3.bf16.xpose.msk.msra.mxu0 %vm3675_vm1, %v2861_v52  ;;  %v2143_v23 = vld [vmem:[%s3663_s8 + $0x768] sm:$0xff]  ;;  %v2144_v24 = vld [vmem:[%s3663_s8 + $0x778] sm:$0xff]  ;;  %v2882_v27 = vpack.c.bf16 %v2112_v22, %v2111_v21  ;;  %v2942_v52 = vpack.c.bf16 %v244_v47, %v243_v45  ;;  %v277_v61 = vld [vmem:[%s3663_s8 + $0x640] sm:$0xff] }
  0x78   : > { %2911 = vmatpush3.bf16.xpose.msk.msra.mxu1 %vm3675_vm1, %v2909_v53  ;;  %2866 = vmatprep.subr.msk.bf16.mxu0 %vm3675_vm1, %v2864_v54  ;;  %v2930_v28 = vpack.c.bf16 %v2144_v24, %v2143_v23  ;;  %v2095_v29 = vld [vmem:[%s3663_s8 + $0x168] sm:$0xff]  ;;  %v2096_v30 = vld [vmem:[%s3663_s8 + $0x178] sm:$0xff]  ;;  %v2990_v53 = vpack.c.bf16 %v276_v49, %v275_v48  ;;  %v278_v62 = vld [vmem:[%s3663_s8 + $0x650] sm:$0xff] }
  0x79   : > { %2914 = vmatprep.subr.msk.bf16.mxu1 %vm3675_vm1, %v2912_v55  ;;  %v2127_v31 = vld [vmem:[%s3663_s8 + $0x568] sm:$0xff]  ;;  %v2128_v32 = vld [vmem:[%s3663_s8 + $0x578] sm:$0xff]  ;;  %v2885_v37 = vpack.c.bf16 %v2096_v30, %v2095_v29  ;;  %v227_v55 = vld [vmem:[%s3663_s8 + $0x20] sm:$0xff] }
  0x7a   : > { %v2933_v38 = vpack.c.bf16 %v2128_v32, %v2127_v31  ;;  %v358_v54 = vld [vmem:[#allocation5 + $0x18] sm:$0xff]  ;;  %v2945_v63 = vpack.c.bf16 %v228_v56, %v227_v55  ;;  %v230_v5 = vld [vmem:[%s3663_s8 + $0x50] sm:$0xff]  ;;  %v261_v6 = vld [vmem:[%s3663_s8 + $0x440] sm:$0xff] }
  0x7b   : > { %v262_v7 = vld [vmem:[%s3663_s8 + $0x450] sm:$0xff]  ;;  %v247_v8 = vld [vmem:[%s3663_s8 + $0x260] sm:$0xff] }
  0x7c   : > { %v248_v9 = vld [vmem:[%s3663_s8 + $0x270] sm:$0xff]  ;;  %v279_v10 = vld [vmem:[%s3663_s8 + $0x660] sm:$0xff] }
  0x7d   : > { %v280_v11 = vld [vmem:[%s3663_s8 + $0x670] sm:$0xff]  ;;  %v263_v18 = vld [vmem:[%s3663_s8 + $0x460] sm:$0xff] }
  0x7e   : > { %v232_v17 = vld [vmem:[%s3663_s8 + $0x70] sm:$0xff]  ;;  %v249_v20 = vld [vmem:[%s3663_s8 + $0x300] sm:$0xff] }
  0x7f   : > { %2869 = vmatpush3.bf16.xpose.msk.msra.mxu0 %vm3675_vm1, %v2867_v1  ;;  %v2993_v1 = vpack.c.bf16 %v260_v59, %v259_v57  ;;  %v264_v19 = vld [vmem:[%s3663_s8 + $0x470] sm:$0xff]  ;;  %v281_v22 = vld [vmem:[%s3663_s8 + $0x700] sm:$0xff] }
  0x80   : > { %2917 = vmatpush3.bf16.xpose.msk.msra.mxu1 %vm3675_vm1, %v2915_v2  ;;  %2872 = vmatprep.subr.msk.bf16.mxu0 %vm3675_vm1, %v2870_v3  ;;  %v2996_v3 = vpack.c.bf16 %v278_v62, %v277_v61  ;;  %v250_v21 = vld [vmem:[%s3663_s8 + $0x310] sm:$0xff]  ;;  %v265_v30 = vld [vmem:[%s3663_s8 + $0x500] sm:$0xff] }
  0x81   : > { %2920 = vmatprep.subr.msk.bf16.mxu1 %vm3675_vm1, %v2918_v4  ;;  %v229_v4 = vld [vmem:[%s3663_s8 + $0x40] sm:$0xff]  ;;  %v282_v23 = vld [vmem:[%s3663_s8 + $0x710] sm:$0xff] }
  0x82   : > { %v2951_v12 = vpack.c.bf16 %v230_v5, %v229_v4  ;;  %v234_v29 = vld [vmem:[%s3663_s8 + $0x110] sm:$0xff]  ;;  %v251_v32 = vld [vmem:[%s3663_s8 + $0x320] sm:$0xff] }
  0x83   : > { %v266_v31 = vld [vmem:[%s3663_s8 + $0x510] sm:$0xff]  ;;  %v283_v34 = vld [vmem:[%s3663_s8 + $0x720] sm:$0xff] }
  0x84   : > { %v252_v33 = vld [vmem:[%s3663_s8 + $0x330] sm:$0xff]  ;;  %v267_v42 = vld [vmem:[%s3663_s8 + $0x520] sm:$0xff] }
  0x85   : > { %v284_v35 = vld [vmem:[%s3663_s8 + $0x730] sm:$0xff]  ;;  %v253_v44 = vld [vmem:[%s3663_s8 + $0x340] sm:$0xff] }
  0x86   : > { %v236_v41 = vld [vmem:[%s3663_s8 + $0x130] sm:$0xff]  ;;  %v285_v47 = vld [vmem:[%s3663_s8 + $0x740] sm:$0xff] }
  0x87   : > { %2875 = vmatpush3.bf16.xpose.msk.msra.mxu0 %vm3675_vm1, %v2873_v13  ;;  %v2999_v13 = vpack.c.bf16 %v262_v7, %v261_v6  ;;  %v268_v43 = vld [vmem:[%s3663_s8 + $0x530] sm:$0xff]  ;;  %v269_v55 = vld [vmem:[%s3663_s8 + $0x540] sm:$0xff] }
  0x88   : > { %2923 = vmatpush3.bf16.xpose.msk.msra.mxu1 %vm3675_vm1, %v2921_v14  ;;  %2878 = vmatprep.subr.msk.bf16.mxu0 %vm3675_vm1, %v2876_v15  ;;  %v2954_v14 = vpack.c.bf16 %v248_v9, %v247_v8  ;;  %v3002_v15 = vpack.c.bf16 %v280_v11, %v279_v10  ;;  %v254_v45 = vld [vmem:[%s3663_s8 + $0x350] sm:$0xff]  ;;  %v255_v57 = vld [vmem:[%s3663_s8 + $0x360] sm:$0xff] }
  0x89   : > { %2926 = vmatprep.subr.msk.bf16.mxu1 %vm3675_vm1, %v2924_v16  ;;  %v231_v16 = vld [vmem:[%s3663_s8 + $0x60] sm:$0xff]  ;;  %v286_v48 = vld [vmem:[%s3663_s8 + $0x750] sm:$0xff] }
  0x8a   : > { %v2957_v24 = vpack.c.bf16 %v232_v17, %v231_v16  ;;  %v270_v56 = vld [vmem:[%s3663_s8 + $0x550] sm:$0xff]  ;;  %v271_v4 = vld [vmem:[%s3663_s8 + $0x560] sm:$0xff] }
  0x8b   : > { %v256_v59 = vld [vmem:[%s3663_s8 + $0x370] sm:$0xff]  ;;  %v3023_v62 = vpack.c.bf16 %v270_v56, %v269_v55  ;;  %v2297_v6 = vld [vmem:[%s3663_s8 + $0x280] sm:$0xff] }
  0x8c   : > { %v272_v5 = vld [vmem:[%s3663_s8 + $0x570] sm:$0xff]  ;;  %v2329_v8 = vld [vmem:[%s3663_s8 + $0x680] sm:$0xff] }
  0x8d   : > { %v2298_v7 = vld [vmem:[%s3663_s8 + $0x290] sm:$0xff]  ;;  %v3029_v11 = vpack.c.bf16 %v272_v5, %v271_v4  ;;  %v2313_v16 = vld [vmem:[%s3663_s8 + $0x480] sm:$0xff] }
  0x8e   : > { %v2330_v9 = vld [vmem:[%s3663_s8 + $0x690] sm:$0xff]  ;;  %v2287_v55 = vld [vmem:[%s3663_s8 + $0xe0] sm:$0xff] }
  0x8f   : > { %2881 = vmatpush3.bf16.xpose.msk.msra.mxu0 %vm3675_vm1, %v2879_v25  ;;  %v3005_v25 = vpack.c.bf16 %v264_v19, %v263_v18  ;;  %v2314_v17 = vld [vmem:[%s3663_s8 + $0x490] sm:$0xff]  ;;  %v2299_v18 = vld [vmem:[%s3663_s8 + $0x2a0] sm:$0xff] }
  0x90   : > { %2929 = vmatpush3.bf16.xpose.msk.msra.mxu1 %vm3675_vm1, %v2927_v26  ;;  %2884 = vmatprep.subr.msk.bf16.mxu0 %vm3675_vm1, %v2882_v27  ;;  %v2960_v26 = vpack.c.bf16 %v250_v21, %v249_v20  ;;  %v3008_v27 = vpack.c.bf16 %v282_v23, %v281_v22  ;;  %v2300_v19 = vld [vmem:[%s3663_s8 + $0x2b0] sm:$0xff]  ;;  %v2331_v20 = vld [vmem:[%s3663_s8 + $0x6a0] sm:$0xff]  ;;  %v3083_v23 = vpack.c.bf16 %v2314_v17, %v2313_v16 }
  0x91   : > { %2932 = vmatprep.subr.msk.bf16.mxu1 %vm3675_vm1, %v2930_v28  ;;  %v233_v28 = vld [vmem:[%s3663_s8 + $0x100] sm:$0xff]  ;;  %v2332_v21 = vld [vmem:[%s3663_s8 + $0x6b0] sm:$0xff] }
  0x92   : > { %v2963_v36 = vpack.c.bf16 %v234_v29, %v233_v28  ;;  %v2284_v28 = vld [vmem:[%s3663_s8 + $0xb0] sm:$0xff]  ;;  %v2315_v29 = vld [vmem:[%s3663_s8 + $0x4a0] sm:$0xff] }
  0x93   : > { %v2288_v56 = vld [vmem:[%s3663_s8 + $0xf0] sm:$0xff]  ;;  %v2289_v4 = vld [vmem:[%s3663_s8 + $0x180] sm:$0xff] }
  0x94   : > { %v2290_v5 = vld [vmem:[%s3663_s8 + $0x190] sm:$0xff]  ;;  %v2291_v16 = vld [vmem:[%s3663_s8 + $0x1a0] sm:$0xff] }
  0x95   : > { %v2292_v17 = vld [vmem:[%s3663_s8 + $0x1b0] sm:$0xff] }
  0x97   : > { %2887 = vmatpush3.bf16.xpose.msk.msra.mxu0 %vm3675_vm1, %v2885_v37  ;;  %v3011_v37 = vpack.c.bf16 %v266_v31, %v265_v30  ;;  %v3984_v30 = vld [vmem:[#allocation5 + $0x20] sm:$0xff]  ;;  %v2316_v31 = vld [vmem:[%s3663_s8 + $0x4b0] sm:$0xff] }
  0x98   : > { %2935 = vmatpush3.bf16.xpose.msk.msra.mxu1 %vm3675_vm1, %v2933_v38  ;;  %2938 = vmatprep.subr.msk.bf16.mxu0 %vm3675_vm1, %v2936_v39  ;;  %v2966_v38 = vpack.c.bf16 %v252_v33, %v251_v32  ;;  %v3014_v39 = vpack.c.bf16 %v284_v35, %v283_v34  ;;  %v2301_v32 = vld [vmem:[%s3663_s8 + $0x2c0] sm:$0xff]  ;;  %v2334_v34 = vld [vmem:[%s3663_s8 + $0x6d0] sm:$0xff] }
  0x99   : > { %2986 = vmatprep.subr.msk.bf16.mxu1 %vm3675_vm1, %v2984_v40  ;;  %v235_v40 = vld [vmem:[%s3663_s8 + $0x120] sm:$0xff] }
  0x9a   : > { %v2969_v49 = vpack.c.bf16 %v236_v41, %v235_v40  ;;  %v2333_v33 = vld [vmem:[%s3663_s8 + $0x6c0] sm:$0xff]  ;;  %v1921_v41 = vld [vmem:[%s4311_s2 + $0x8] sm:$0xff] }
  0x9b   : > { %v3092_v40 = vpack.c.bf16 %v2334_v34, %v2333_v33  ;;  %v2312_v33 = vld [vmem:[%s3663_s8 + $0x3f0] sm:$0xff]  ;;  %v2343_v34 = vld [vmem:[%s3663_s8 + $0x7e0] sm:$0xff] }
  0x9e   : > { %2585 = vmatmul.mubr.msk.f32.vlgmr.msra.gmra.mrb[0].mxu0 %vm359_vm0, %v3736_v46 }
  0x9f   : > { %2621 = vmatmul.mubr.msk.f32.vlgmr.msra.gmra.mrb[0].mxu1 %vm359_vm0, %v3736_v46  ;;  %2941 = vmatpush3.bf16.xpose.msk.msra.mxu0 %vm3675_vm1, %v2939_v50  ;;  %v246_v46 = vld [vmem:[%s3663_s8 + $0x250] sm:$0xff]  ;;  %v3017_v50 = vpack.c.bf16 %v268_v43, %v267_v42  ;;  %v2285_v42 = vld [vmem:[%s3663_s8 + $0xc0] sm:$0xff] }
  0xa0   : > { %2989 = vmatpush3.bf16.xpose.msk.msra.mxu1 %vm3675_vm1, %v2987_v51  ;;  %2944 = vmatprep.subr.msk.bf16.mxu0 %vm3675_vm1, %v2942_v52  ;;  %v2948_v2 = vpack.c.bf16 %v246_v46, %v245_v60  ;;  %v2972_v51 = vpack.c.bf16 %v254_v45, %v253_v44  ;;  %v3020_v52 = vpack.c.bf16 %v286_v48, %v285_v47  ;;  %v287_v60 = vld [vmem:[%s3663_s8 + $0x760] sm:$0xff]  ;;  %v288_v46 = vld [vmem:[%s3663_s8 + $0x770] sm:$0xff] }
  0xa1   : > { %2992 = vmatprep.subr.msk.bf16.mxu1 %vm3675_vm1, %v2990_v53  ;;  %2586 = vmatprep.mubr.msk.f32.mxu0 %vm359_vm0, %v358_v54  ;;  %v237_v53 = vld [vmem:[%s3663_s8 + $0x140] sm:$0xff]  ;;  %v2286_v43 = vld [vmem:[%s3663_s8 + $0xd0] sm:$0xff] }
  0xa2   : > { %2622 = vmatprep.mubr.msk.f32.mxu1 %vm359_vm0, %v358_v54  ;;  %2587 = vmatmul.mubr.msk.f32.gmra.mrb[2].mxu0 %vm359_vm0, %v358_v54  ;;  %v2317_v44 = vld [vmem:[%s3663_s8 + $0x4c0] sm:$0xff]  ;;  %v2318_v45 = vld [vmem:[%s3663_s8 + $0x4d0] sm:$0xff] }
  0xa3   : > { %2623 = vmatmul.mubr.msk.f32.gmra.mrb[2].mxu1 %vm359_vm0, %v358_v54  ;;  %2656 = vmatprep.mubr.msk.f32.mxu0 %vm359_vm0, %v3842_v58  ;;  %v238_v54 = vld [vmem:[%s3663_s8 + $0x150] sm:$0xff]  ;;  %v2303_v47 = vld [vmem:[%s3663_s8 + $0x2e0] sm:$0xff] }
  0xa4   : > { %2692 = vmatprep.mubr.msk.f32.mxu1 %vm359_vm0, %v3842_v58  ;;  %v2975_v61 = vpack.c.bf16 %v238_v54, %v237_v53  ;;  %v2304_v48 = vld [vmem:[%s3663_s8 + $0x2f0] sm:$0xff] }
  0xa5   : > { %v3050_v53 = vpack.c.bf16 %v2304_v48, %v2303_v47  ;;  %v2461_v47 = vld [vmem:[%s3663_s8 + $0x688] sm:$0xff]  ;;  %v2462_v48 = vld [vmem:[%s3663_s8 + $0x698] sm:$0xff] }
  0xa7   : > { %2947 = vmatpush3.bf16.xpose.msk.msra.mxu0 %vm3675_vm1, %v2945_v63  ;;  %v2978_v63 = vpack.c.bf16 %v256_v59, %v255_v57  ;;  %v2319_v57 = vld [vmem:[%s3663_s8 + $0x4e0] sm:$0xff]  ;;  %v2320_v59 = vld [vmem:[%s3663_s8 + $0x4f0] sm:$0xff] }
  0xa8   : > { %2995 = vmatpush3.bf16.xpose.msk.msra.mxu1 %vm3675_vm1, %v2993_v1  ;;  %2950 = vmatprep.subr.msk.bf16.mxu0 %vm3675_vm1, %v2948_v2  ;;  %v3026_v1 = vpack.c.bf16 %v288_v46, %v287_v60  ;;  %v239_v2 = vld [vmem:[%s3663_s8 + $0x160] sm:$0xff]  ;;  %v2306_v46 = vld [vmem:[%s3663_s8 + $0x390] sm:$0xff] }
  0xa9   : > { %2998 = vmatprep.subr.msk.bf16.mxu1 %vm3675_vm1, %v2996_v3  ;;  %v240_v3 = vld [vmem:[%s3663_s8 + $0x170] sm:$0xff]  ;;  %v2305_v60 = vld [vmem:[%s3663_s8 + $0x380] sm:$0xff] }
  0xaa   : > { %v2981_v10 = vpack.c.bf16 %v240_v3, %v239_v2  ;;  %v3056_v2 = vpack.c.bf16 %v2306_v46, %v2305_v60  ;;  %v2463_v60 = vld [vmem:[%s3663_s8 + $0x6a8] sm:$0xff]  ;;  %v2464_v46 = vld [vmem:[%s3663_s8 + $0x6b8] sm:$0xff] }
  0xaf   : > { %2953 = vmatpush3.bf16.xpose.msk.msra.mxu0 %vm3675_vm1, %v2951_v12  ;;  %v3032_v12 = vpack.c.bf16 %v2298_v7, %v2297_v6  ;;  %v2321_v6 = vld [vmem:[%s3663_s8 + $0x580] sm:$0xff]  ;;  %v2322_v7 = vld [vmem:[%s3663_s8 + $0x590] sm:$0xff] }
  0xb0   : > { %3001 = vmatpush3.bf16.xpose.msk.msra.mxu1 %vm3675_vm1, %v2999_v13  ;;  %2956 = vmatprep.subr.msk.bf16.mxu0 %vm3675_vm1, %v2954_v14  ;;  %v3080_v13 = vpack.c.bf16 %v2330_v9, %v2329_v8  ;;  %v2281_v14 = vld [vmem:[%s3663_s8 + $0x80] sm:$0xff]  ;;  %v2308_v9 = vld [vmem:[%s3663_s8 + $0x3b0] sm:$0xff] }
  0xb1   : > { %3004 = vmatprep.subr.msk.bf16.mxu1 %vm3675_vm1, %v3002_v15  ;;  %v2282_v15 = vld [vmem:[%s3663_s8 + $0x90] sm:$0xff]  ;;  %v2307_v8 = vld [vmem:[%s3663_s8 + $0x3a0] sm:$0xff] }
  0xb2   : > { %v3035_v22 = vpack.c.bf16 %v2282_v15, %v2281_v14  ;;  %v3062_v14 = vpack.c.bf16 %v2308_v9, %v2307_v8  ;;  %v2433_v8 = vld [vmem:[%s3663_s8 + $0x2c8] sm:$0xff] }
  0xb3   : > { %v2465_v9 = vld [vmem:[%s3663_s8 + $0x6c8] sm:$0xff] }
  0xb7   : > { %2959 = vmatpush3.bf16.xpose.msk.msra.mxu0 %vm3675_vm1, %v2957_v24  ;;  %v3038_v24 = vpack.c.bf16 %v2300_v19, %v2299_v18  ;;  %v2323_v18 = vld [vmem:[%s3663_s8 + $0x5a0] sm:$0xff]  ;;  %v2324_v19 = vld [vmem:[%s3663_s8 + $0x5b0] sm:$0xff] }
  0xb8   : > { %3007 = vmatpush3.bf16.xpose.msk.msra.mxu1 %vm3675_vm1, %v3005_v25  ;;  %2962 = vmatprep.subr.msk.bf16.mxu0 %vm3675_vm1, %v2960_v26  ;;  %v3086_v25 = vpack.c.bf16 %v2332_v21, %v2331_v20  ;;  %v290_v26 = vld [vmem:[#allocation5 + $0x8] sm:$0xff]  ;;  %v2309_v20 = vld [vmem:[%s3663_s8 + $0x3c0] sm:$0xff]  ;;  %v2310_v21 = vld [vmem:[%s3663_s8 + $0x3d0] sm:$0xff] }
  0xb9   : > { %3010 = vmatprep.subr.msk.bf16.mxu1 %vm3675_vm1, %v3008_v27  ;;  %v2283_v27 = vld [vmem:[%s3663_s8 + $0xa0] sm:$0xff] }
  0xba   : > { %v3041_v35 = vpack.c.bf16 %v2284_v28, %v2283_v27  ;;  %v2293_v28 = vld [vmem:[%s3663_s8 + $0x1c0] sm:$0xff] }
  0xbf   : > { %2965 = vmatpush3.bf16.xpose.msk.msra.mxu0 %vm3675_vm1, %v2963_v36  ;;  %v1920_v36 = vld [vmem:[%s4311_s2] sm:$0xff] }
  0xc0   : > { %3013 = vmatpush3.bf16.xpose.msk.msra.mxu1 %vm3675_vm1, %v3011_v37  ;;  %2968 = vmatprep.subr.msk.bf16.mxu0 %vm3675_vm1, %v2966_v38  ;;  %v3089_v37 = vpack.c.bf16 %v2316_v31, %v2315_v29  ;;  %v2294_v29 = vld [vmem:[%s3663_s8 + $0x1d0] sm:$0xff]  ;;  %v2325_v31 = vld [vmem:[%s3663_s8 + $0x5c0] sm:$0xff] }
  0xc1   : > { %3016 = vmatprep.subr.msk.bf16.mxu1 %vm3675_vm1, %v3014_v39  ;;  %v3477_v39 = vmov 0  }
  0xc2   : > { %3326 = vset.pattern.permute.xlu0 %v3477_v39 }
  0xc3   : > { %1924 = vperm.xlu0 %3326, %v1920_v36   ;;  %v3071_v36 = vpack.c.bf16 %v2294_v29, %v2293_v28  ;;  %v2420_v28 = vld [vmem:[%s3663_s8 + $0xf8] sm:$0xff]  ;;  %v2451_v29 = vld [vmem:[%s3663_s8 + $0x4e8] sm:$0xff] }
  0xc7   : > { %2971 = vmatpush3.bf16.xpose.msk.msra.mxu0 %vm3675_vm1, %v2969_v49  ;;  %1929 = vperm.xlu0 %3326, %v1921_v41   ;;  %v2335_v49 = vld [vmem:[%s3663_s8 + $0x6e0] sm:$0xff]  ;;  %v2296_v41 = vld [vmem:[%s3663_s8 + $0x1f0] sm:$0xff] }
  0xc8   : > { %3019 = vmatpush3.bf16.xpose.msk.msra.mxu1 %vm3675_vm1, %v3017_v50  ;;  %2974 = vmatprep.subr.msk.bf16.mxu0 %vm3675_vm1, %v2972_v51  ;;  %v2336_v50 = vld [vmem:[%s3663_s8 + $0x6f0] sm:$0xff]  ;;  %v3047_v51 = vpack.c.bf16 %v2286_v43, %v2285_v42  ;;  %v2327_v42 = vld [vmem:[%s3663_s8 + $0x5e0] sm:$0xff] }
  0xc9   : > { %3022 = vmatprep.subr.msk.bf16.mxu1 %vm3675_vm1, %v3020_v52  ;;  %v3095_v52 = vpack.c.bf16 %v2318_v45, %v2317_v44  ;;  %v3098_v54 = vpack.c.bf16 %v2336_v50, %v2335_v49  ;;  %v2328_v43 = vld [vmem:[%s3663_s8 + $0x5f0] sm:$0xff]  ;;  %v2429_v44 = vld [vmem:[%s3663_s8 + $0x288] sm:$0xff]  ;;  %v2430_v45 = vld [vmem:[%s3663_s8 + $0x298] sm:$0xff] }
  0xca   : > { %v3125_v50 = vpack.c.bf16 %v2328_v43, %v2327_v42  ;;  %v2454_v42 = vld [vmem:[%s3663_s8 + $0x598] sm:$0xff]  ;;  %v2439_v43 = vld [vmem:[%s3663_s8 + $0x3a8] sm:$0xff] }
  0xcf   : > { %2977 = vmatpush3.bf16.xpose.msk.msra.mxu0 %vm3675_vm1, %v2975_v61  ;;  %v2337_v61 = vld [vmem:[%s3663_s8 + $0x780] sm:$0xff] }
  0xd0   : > { %3025 = vmatpush3.bf16.xpose.msk.msra.mxu1 %vm3675_vm1, %v3023_v62  ;;  %2980 = vmatprep.subr.msk.bf16.mxu0 %vm3675_vm1, %v2978_v63  ;;  %v2338_v62 = vld [vmem:[%s3663_s8 + $0x790] sm:$0xff]  ;;  %v3053_v63 = vpack.c.bf16 %v2288_v56, %v2287_v55  ;;  %v2445_v55 = vld [vmem:[%s3663_s8 + $0x488] sm:$0xff]  ;;  %v2446_v56 = vld [vmem:[%s3663_s8 + $0x498] sm:$0xff] }
  0xd1   : > { %3028 = vmatprep.subr.msk.bf16.mxu1 %vm3675_vm1, %v3026_v1  ;;  %v3101_v1 = vpack.c.bf16 %v2320_v59, %v2319_v57  ;;  %v3104_v3 = vpack.c.bf16 %v2338_v62, %v2337_v61  ;;  %v2431_v57 = vld [vmem:[%s3663_s8 + $0x2a8] sm:$0xff]  ;;  %v2432_v59 = vld [vmem:[%s3663_s8 + $0x2b8] sm:$0xff]  ;;  %v3179_v62 = vpack.c.bf16 %v2446_v56, %v2445_v55 }
  0xd2   : > { %v2456_v55 = vld [vmem:[%s3663_s8 + $0x5b8] sm:$0xff]  ;;  %v2441_v56 = vld [vmem:[%s3663_s8 + $0x3c8] sm:$0xff] }
  0xd7   : > { %2983 = vmatpush3.bf16.xpose.msk.msra.mxu0 %vm3675_vm1, %v2981_v10  ;;  %v2339_v10 = vld [vmem:[%s3663_s8 + $0x7a0] sm:$0xff] }
  0xd8   : > { %3031 = vmatpush3.bf16.xpose.msk.msra.mxu1 %vm3675_vm1, %v3029_v11  ;;  %3034 = vmatprep.subr.msk.bf16.mxu0 %vm3675_vm1, %v3032_v12  ;;  %v2340_v11 = vld [vmem:[%s3663_s8 + $0x7b0] sm:$0xff]  ;;  %v3059_v12 = vpack.c.bf16 %v2290_v5, %v2289_v4  ;;  %v2416_v4 = vld [vmem:[%s3663_s8 + $0xb8] sm:$0xff]  ;;  %v2447_v5 = vld [vmem:[%s3663_s8 + $0x4a8] sm:$0xff] }
  0xd9   : > { %3082 = vmatprep.subr.msk.bf16.mxu1 %vm3675_vm1, %v3080_v13  ;;  %v3107_v13 = vpack.c.bf16 %v2322_v7, %v2321_v6  ;;  %v3110_v15 = vpack.c.bf16 %v2340_v11, %v2339_v10  ;;  %v4132_v6 = vld [vmem:[#allocation5 + $0x30] sm:$0xff]  ;;  %v2448_v7 = vld [vmem:[%s3663_s8 + $0x4b8] sm:$0xff] }
  0xda   : > { %v2466_v10 = vld [vmem:[%s3663_s8 + $0x6d8] sm:$0xff] }
  0xde   : > { %2657 = vmatmul.mubr.msk.f32.vlgmr.msra.gmra.mrb[0].mxu0 %vm359_vm0, %v3842_v58 }
  0xdf   : > { %2693 = vmatmul.mubr.msk.f32.vlgmr.msra.gmra.mrb[0].mxu1 %vm359_vm0, %v3842_v58  ;;  %3037 = vmatpush3.bf16.xpose.msk.msra.mxu0 %vm3675_vm1, %v3035_v22  ;;  %v2302_v58 = vld [vmem:[%s3663_s8 + $0x2d0] sm:$0xff]  ;;  %v2341_v22 = vld [vmem:[%s3663_s8 + $0x7c0] sm:$0xff] }
  0xe0   : > { %3085 = vmatpush3.bf16.xpose.msk.msra.mxu1 %vm3675_vm1, %v3083_v23  ;;  %3040 = vmatprep.subr.msk.bf16.mxu0 %vm3675_vm1, %v3038_v24  ;;  %v3044_v38 = vpack.c.bf16 %v2302_v58, %v2301_v32  ;;  %v2342_v23 = vld [vmem:[%s3663_s8 + $0x7d0] sm:$0xff]  ;;  %v3065_v24 = vpack.c.bf16 %v2292_v17, %v2291_v16  ;;  %v2311_v58 = vld [vmem:[%s3663_s8 + $0x3e0] sm:$0xff]  ;;  %v2418_v16 = vld [vmem:[%s3663_s8 + $0xd8] sm:$0xff] }
  0xe1   : > { %3088 = vmatprep.subr.msk.bf16.mxu1 %vm3675_vm1, %v3086_v25  ;;  %2658 = vmatprep.mubr.msk.f32.mxu0 %vm359_vm0, %v290_v26  ;;  %v3113_v25 = vpack.c.bf16 %v2324_v19, %v2323_v18  ;;  %v3116_v27 = vpack.c.bf16 %v2342_v23, %v2341_v22  ;;  %v2326_v32 = vld [vmem:[%s3663_s8 + $0x5d0] sm:$0xff]  ;;  %v2449_v17 = vld [vmem:[%s3663_s8 + $0x4c8] sm:$0xff]  ;;  %v2450_v18 = vld [vmem:[%s3663_s8 + $0x4d8] sm:$0xff] }
  0xe2   : > { %2694 = vmatprep.mubr.msk.f32.mxu1 %vm359_vm0, %v290_v26  ;;  %2659 = vmatmul.mubr.msk.f32.gmra.mrb[2].mxu0 %vm359_vm0, %v290_v26  ;;  %v2435_v19 = vld [vmem:[%s3663_s8 + $0x2e8] sm:$0xff]  ;;  %v2468_v22 = vld [vmem:[%s3663_s8 + $0x6f8] sm:$0xff] }
  0xe3   : > { %2695 = vmatmul.mubr.msk.f32.gmra.mrb[2].mxu1 %vm359_vm0, %v290_v26  ;;  %2728 = vmatprep.mubr.msk.f32.mxu0 %vm359_vm0, %v3984_v30  ;;  %v3068_v26 = vpack.c.bf16 %v2310_v21, %v2309_v20  ;;  %v2436_v20 = vld [vmem:[%s3663_s8 + $0x2f8] sm:$0xff]  ;;  %v2467_v21 = vld [vmem:[%s3663_s8 + $0x6e8] sm:$0xff] }
  0xe4   : > { %2764 = vmatprep.mubr.msk.f32.mxu1 %vm359_vm0, %v3984_v30 }
  0xe7   : > { %3043 = vmatpush3.bf16.xpose.msk.msra.mxu0 %vm3675_vm1, %v3041_v35  ;;  %v2344_v35 = vld [vmem:[%s3663_s8 + $0x7f0] sm:$0xff] }
  0xe8   : > { %3091 = vmatpush3.bf16.xpose.msk.msra.mxu1 %vm3675_vm1, %v3089_v37  ;;  %3046 = vmatprep.subr.msk.bf16.mxu0 %vm3675_vm1, %v3044_v38  ;;  %v3119_v37 = vpack.c.bf16 %v2326_v32, %v2325_v31  ;;  %v3074_v38 = vpack.c.bf16 %v2312_v33, %v2311_v58  ;;  %v3122_v39 = vpack.c.bf16 %v2344_v35, %v2343_v34  ;;  %v2452_v31 = vld [vmem:[%s3663_s8 + $0x4f8] sm:$0xff]  ;;  %v2437_v32 = vld [vmem:[%s3663_s8 + $0x388] sm:$0xff] }
  0xe9   : > { %3094 = vmatprep.subr.msk.bf16.mxu1 %vm3675_vm1, %v3092_v40  ;;  %v2295_v40 = vld [vmem:[%s3663_s8 + $0x1e0] sm:$0xff]  ;;  %v2438_v58 = vld [vmem:[%s3663_s8 + $0x398] sm:$0xff]  ;;  %v2469_v33 = vld [vmem:[%s3663_s8 + $0x788] sm:$0xff] }
  0xea   : > { %v3077_v49 = vpack.c.bf16 %v2296_v41, %v2295_v40  ;;  %v2470_v34 = vld [vmem:[%s3663_s8 + $0x798] sm:$0xff]  ;;  %v2453_v41 = vld [vmem:[%s3663_s8 + $0x588] sm:$0xff] }
  0xeb   : > { %v2422_v40 = vld [vmem:[%s3663_s8 + $0x198] sm:$0xff] }
  0xef   : > { %3049 = vmatpush3.bf16.xpose.msk.msra.mxu0 %vm3675_vm1, %v3047_v51  ;;  %v3128_v51 = vpack.c.bf16 %v2430_v45, %v2429_v44  ;;  %v2440_v44 = vld [vmem:[%s3663_s8 + $0x3b8] sm:$0xff]  ;;  %v2471_v45 = vld [vmem:[%s3663_s8 + $0x7a8] sm:$0xff] }
  0xf0   : > { %3097 = vmatpush3.bf16.xpose.msk.msra.mxu1 %vm3675_vm1, %v3095_v52  ;;  %3052 = vmatprep.subr.msk.bf16.mxu0 %vm3675_vm1, %v3050_v53  ;;  %v3176_v52 = vpack.c.bf16 %v2462_v48, %v2461_v47  ;;  %v2413_v53 = vld [vmem:[%s3663_s8 + $0x88] sm:$0xff]  ;;  %v2472_v47 = vld [vmem:[%s3663_s8 + $0x7b8] sm:$0xff] }
  0xf1   : > { %3100 = vmatprep.subr.msk.bf16.mxu1 %vm3675_vm1, %v3098_v54  ;;  %v2414_v54 = vld [vmem:[%s3663_s8 + $0x98] sm:$0xff] }
  0xf2   : > { %v3131_v61 = vpack.c.bf16 %v2414_v54, %v2413_v53  ;;  %v2424_v53 = vld [vmem:[%s3663_s8 + $0x1b8] sm:$0xff]  ;;  %v2455_v54 = vld [vmem:[%s3663_s8 + $0x5a8] sm:$0xff] }
  0xf7   : > { %3055 = vmatpush3.bf16.xpose.msk.msra.mxu0 %vm3675_vm1, %v3053_v63  ;;  %v3134_v63 = vpack.c.bf16 %v2432_v59, %v2431_v57  ;;  %v2442_v57 = vld [vmem:[%s3663_s8 + $0x3d8] sm:$0xff]  ;;  %v2473_v59 = vld [vmem:[%s3663_s8 + $0x7c8] sm:$0xff] }
  0xf8   : > { %3103 = vmatpush3.bf16.xpose.msk.msra.mxu1 %vm3675_vm1, %v3101_v1  ;;  %3058 = vmatprep.subr.msk.bf16.mxu0 %vm3675_vm1, %v3056_v2  ;;  %v3182_v1 = vpack.c.bf16 %v2464_v46, %v2463_v60  ;;  %v1131_v2 = vld [vmem:[#allocation5 + $0x28] sm:$0xff]  ;;  %v2474_v60 = vld [vmem:[%s3663_s8 + $0x7d8] sm:$0xff] }
  0xf9   : > { %3106 = vmatprep.subr.msk.bf16.mxu1 %vm3675_vm1, %v3104_v3  ;;  %v2415_v3 = vld [vmem:[%s3663_s8 + $0xa8] sm:$0xff] }
  0xfa   : > { %v3137_v11 = vpack.c.bf16 %v2416_v4, %v2415_v3  ;;  %v2457_v3 = vld [vmem:[%s3663_s8 + $0x5c8] sm:$0xff]  ;;  %v2458_v4 = vld [vmem:[%s3663_s8 + $0x5d8] sm:$0xff] }
  0xff   : > { %3061 = vmatpush3.bf16.xpose.msk.msra.mxu0 %vm3675_vm1, %v3059_v12  ;;  %v3185_v12 = vpack.c.bf16 %v2448_v7, %v2447_v5  ;;  %v2443_v5 = vld [vmem:[%s3663_s8 + $0x3e8] sm:$0xff]  ;;  %v2444_v7 = vld [vmem:[%s3663_s8 + $0x3f8] sm:$0xff] }
 0x100   : > { %3109 = vmatpush3.bf16.xpose.msk.msra.mxu1 %vm3675_vm1, %v3107_v13  ;;  %3064 = vmatprep.subr.msk.bf16.mxu0 %vm3675_vm1, %v3062_v14  ;;  %v3188_v14 = vpack.c.bf16 %v2466_v10, %v2465_v9  ;;  %v3215_v10 = vpack.c.bf16 %v2458_v4, %v2457_v3 }
 0x101   : > { %3112 = vmatprep.subr.msk.bf16.mxu1 %vm3675_vm1, %v3110_v15  ;;  %v2417_v15 = vld [vmem:[%s3663_s8 + $0xc8] sm:$0xff] }
 0x102   : > { %v3143_v23 = vpack.c.bf16 %v2418_v16, %v2417_v15  ;;  %v2459_v15 = vld [vmem:[%s3663_s8 + $0x5e8] sm:$0xff]  ;;  %v2460_v16 = vld [vmem:[%s3663_s8 + $0x5f8] sm:$0xff] }
 0x107   : > { %3067 = vmatpush3.bf16.xpose.msk.msra.mxu0 %vm3675_vm1, %v3065_v24  ;;  %v3191_v24 = vpack.c.bf16 %v2450_v18, %v2449_v17  ;;  %v3221_v18 = vpack.c.bf16 %v2460_v16, %v2459_v15 }
 0x108   : > { %3115 = vmatpush3.bf16.xpose.msk.msra.mxu1 %vm3675_vm1, %v3113_v25  ;;  %3070 = vmatprep.subr.msk.bf16.mxu0 %vm3675_vm1, %v3068_v26  ;;  %v3146_v25 = vpack.c.bf16 %v2436_v20, %v2435_v19  ;;  %v3194_v26 = vpack.c.bf16 %v2468_v22, %v2467_v21  ;;  %v1559_v19 = vld [vmem:[#allocation5 + $0x38] sm:$0xff] }
 0x109   : > { %3118 = vmatprep.subr.msk.bf16.mxu1 %vm3675_vm1, %v3116_v27  ;;  %v2419_v27 = vld [vmem:[%s3663_s8 + $0xe8] sm:$0xff] }
 0x10a   : > { %v3149_v35 = vpack.c.bf16 %v2420_v28, %v2419_v27 }
 0x10f   : > { %3073 = vmatpush3.bf16.xpose.msk.msra.mxu0 %vm3675_vm1, %v3071_v36  ;;  %v3197_v36 = vpack.c.bf16 %v2452_v31, %v2451_v29 }
 0x110   : > { %3121 = vmatpush3.bf16.xpose.msk.msra.mxu1 %vm3675_vm1, %v3119_v37  ;;  %3076 = vmatprep.subr.msk.bf16.mxu0 %vm3675_vm1, %v3074_v38  ;;  %v3152_v37 = vpack.c.bf16 %v2438_v58, %v2437_v32  ;;  %v3200_v38 = vpack.c.bf16 %v2470_v34, %v2469_v33 }
 0x111   : > { %3124 = vmatprep.subr.msk.bf16.mxu1 %vm3675_vm1, %v3122_v39  ;;  %v2421_v39 = vld [vmem:[%s3663_s8 + $0x188] sm:$0xff] }
 0x112   : > { %v3155_v48 = vpack.c.bf16 %v2422_v40, %v2421_v39 }
 0x117   : > { %3079 = vmatpush3.bf16.xpose.msk.msra.mxu0 %vm3675_vm1, %v3077_v49  ;;  %v3203_v49 = vpack.c.bf16 %v2454_v42, %v2453_v41 }
 0x118   : > { %3127 = vmatpush3.bf16.xpose.msk.msra.mxu1 %vm3675_vm1, %v3125_v50  ;;  %3130 = vmatprep.subr.msk.bf16.mxu0 %vm3675_vm1, %v3128_v51  ;;  %v3158_v50 = vpack.c.bf16 %v2440_v44, %v2439_v43  ;;  %v3206_v51 = vpack.c.bf16 %v2472_v47, %v2471_v45 }
 0x119   : > { %3178 = vmatprep.subr.msk.bf16.mxu1 %vm3675_vm1, %v3176_v52  ;;  %v2423_v52 = vld [vmem:[%s3663_s8 + $0x1a8] sm:$0xff] }
 0x11a   : > { %v3161_v46 = vpack.c.bf16 %v2424_v53, %v2423_v52 }
 0x11e   : > { %2729 = vmatmul.mubr.msk.f32.vlgmr.msra.gmra.mrb[0].mxu0 %vm359_vm0, %v3984_v30 }
 0x11f   : > { %2765 = vmatmul.mubr.msk.f32.vlgmr.msra.gmra.mrb[0].mxu1 %vm359_vm0, %v3984_v30  ;;  %3133 = vmatpush3.bf16.xpose.msk.msra.mxu0 %vm3675_vm1, %v3131_v61  ;;  %v2434_v30 = vld [vmem:[%s3663_s8 + $0x2d8] sm:$0xff]  ;;  %v3209_v61 = vpack.c.bf16 %v2456_v55, %v2455_v54 }
 0x120   : > { %3181 = vmatpush3.bf16.xpose.msk.msra.mxu1 %vm3675_vm1, %v3179_v62  ;;  %3136 = vmatprep.subr.msk.bf16.mxu0 %vm3675_vm1, %v3134_v63  ;;  %v3140_v13 = vpack.c.bf16 %v2434_v30, %v2433_v8  ;;  %v3164_v62 = vpack.c.bf16 %v2442_v57, %v2441_v56  ;;  %v3212_v63 = vpack.c.bf16 %v2474_v60, %v2473_v59  ;;  %v2475_v8 = vld [vmem:[%s3663_s8 + $0x7e8] sm:$0xff]  ;;  %v2476_v30 = vld [vmem:[%s3663_s8 + $0x7f8] sm:$0xff] }
 0x121   : > { %3184 = vmatprep.subr.msk.bf16.mxu1 %vm3675_vm1, %v3182_v1  ;;  %2730 = vmatprep.mubr.msk.f32.mxu0 %vm359_vm0, %v1131_v2  ;;  %v2425_v1 = vld [vmem:[%s3663_s8 + $0x1c8] sm:$0xff] }
 0x122   : > { %2766 = vmatprep.mubr.msk.f32.mxu1 %vm359_vm0, %v1131_v2  ;;  %2731 = vmatmul.mubr.msk.f32.gmra.mrb[2].mxu0 %vm359_vm0, %v1131_v2 }
 0x123   : > { %2767 = vmatmul.mubr.msk.f32.gmra.mrb[2].mxu1 %vm359_vm0, %v1131_v2  ;;  %2800 = vmatprep.mubr.msk.f32.mxu0 %vm359_vm0, %v4132_v6  ;;  %v2426_v2 = vld [vmem:[%s3663_s8 + $0x1d8] sm:$0xff] }
 0x124   : > { %2836 = vmatprep.mubr.msk.f32.mxu1 %vm359_vm0, %v4132_v6  ;;  %v3167_v9 = vpack.c.bf16 %v2426_v2, %v2425_v1 }
 0x127   : > { %3139 = vmatpush3.bf16.xpose.msk.msra.mxu0 %vm3675_vm1, %v3137_v11  ;;  %v3170_v11 = vpack.c.bf16 %v2444_v7, %v2443_v5 }
 0x128   : > { %3187 = vmatpush3.bf16.xpose.msk.msra.mxu1 %vm3675_vm1, %v3185_v12  ;;  %3142 = vmatprep.subr.msk.bf16.mxu0 %vm3675_vm1, %v3140_v13  ;;  %v3218_v12 = vpack.c.bf16 %v2476_v30, %v2475_v8  ;;  %v2427_v13 = vld [vmem:[%s3663_s8 + $0x1e8] sm:$0xff] }
 0x129   : > { %3190 = vmatprep.subr.msk.bf16.mxu1 %vm3675_vm1, %v3188_v14  ;;  %v2428_v14 = vld [vmem:[%s3663_s8 + $0x1f8] sm:$0xff] }
 0x12a   : > { %v3173_v17 = vpack.c.bf16 %v2428_v14, %v2427_v13 }
 0x12f   : > { %3145 = vmatpush3.bf16.xpose.msk.msra.mxu0 %vm3675_vm1, %v3143_v23 }
 0x130   : > { %3193 = vmatpush3.bf16.xpose.msk.msra.mxu1 %vm3675_vm1, %v3191_v24  ;;  %3148 = vmatprep.subr.msk.bf16.mxu0 %vm3675_vm1, %v3146_v25 }
 0x131   : > { %3196 = vmatprep.subr.msk.bf16.mxu1 %vm3675_vm1, %v3194_v26 }
 0x137   : > { %3151 = vmatpush3.bf16.xpose.msk.msra.mxu0 %vm3675_vm1, %v3149_v35 }
 0x138   : > { %3199 = vmatpush3.bf16.xpose.msk.msra.mxu1 %vm3675_vm1, %v3197_v36  ;;  %3154 = vmatprep.subr.msk.bf16.mxu0 %vm3675_vm1, %v3152_v37 }
 0x139   : > { %3202 = vmatprep.subr.msk.bf16.mxu1 %vm3675_vm1, %v3200_v38 }
 0x13f   : > { %3157 = vmatpush3.bf16.xpose.msk.msra.mxu0 %vm3675_vm1, %v3155_v48 }
 0x140   : > { %3205 = vmatpush3.bf16.xpose.msk.msra.mxu1 %vm3675_vm1, %v3203_v49  ;;  %3160 = vmatprep.subr.msk.bf16.mxu0 %vm3675_vm1, %v3158_v50 }
 0x141   : > { %3208 = vmatprep.subr.msk.bf16.mxu1 %vm3675_vm1, %v3206_v51 }
 0x142   : > { %v1925_v20 = vpop.permute.xlu0 %1924 }
 0x146   : > { %v1930_v29 = vpop.permute.xlu0 %1929 }
 0x147   : > { %3163 = vmatpush3.bf16.xpose.msk.msra.mxu0 %vm3675_vm1, %v3161_v46 }
 0x148   : > { %3211 = vmatpush3.bf16.xpose.msk.msra.mxu1 %vm3675_vm1, %v3209_v61  ;;  %3166 = vmatprep.subr.msk.bf16.mxu0 %vm3675_vm1, %v3164_v62 }
 0x149   : > { %3214 = vmatprep.subr.msk.bf16.mxu1 %vm3675_vm1, %v3212_v63 }
 0x14f   : > { %3169 = vmatpush3.bf16.xpose.msk.msra.mxu0 %vm3675_vm1, %v3167_v9 }
 0x150   : > { %3217 = vmatpush3.bf16.xpose.msk.msra.mxu1 %vm3675_vm1, %v3215_v10  ;;  %3172 = vmatprep.subr.msk.bf16.mxu0 %vm3675_vm1, %v3170_v11 }
 0x151   : > { %3220 = vmatprep.subr.msk.bf16.mxu1 %vm3675_vm1, %v3218_v12 }
 0x157   : > { %3175 = vmatpush3.bf16.xpose.msk.msra.mxu0 %vm3675_vm1, %v3173_v17 }
 0x158   : > { %3223 = vmatpush3.bf16.xpose.msk.msra.mxu1 %vm3675_vm1, %v3221_v18 }
 0x15e   : > { %2801 = vmatmul.mubr.msk.f32.vlgmr.msra.gmra.mrb[0].mxu0 %vm359_vm0, %v4132_v6 }
 0x15f   : > { %2837 = vmatmul.mubr.msk.f32.vlgmr.msra.gmra.mrb[0].mxu1 %vm359_vm0, %v4132_v6  ;;  %2802 = vmatprep.mubr.msk.f32.mxu0 %vm359_vm0, %v1559_v19 }
 0x160   : > { %2838 = vmatprep.mubr.msk.f32.mxu1 %vm359_vm0, %v1559_v19 }
 0x162   : > { %2803 = vmatmul.mubr.msk.f32.gmra.mrb[2].mxu0 %vm359_vm0, %v1559_v19 }
 0x163   : > { %2839 = vmatmul.mubr.msk.f32.gmra.mrb[2].mxu1 %vm359_vm0, %v1559_v19 }
 0x231   : > { %v1824_v21 = vpop.f32.mrb[0].mxu0 }
 0x232   : > { %v1932_v0 = vadd.f32 %v1925_v20, %v1824_v21  ;;  %v1901_v22 = vpop.f32.mrb[0].mxu1  ;;  %v1826_v23 = vpop.f32.mrb[1].mxu0 }
 0x233   : > { %v1934_v24 = vadd.f32 %v1925_v20, %v1901_v22  ;;  %v1933_v25 = vadd.f32 %v1925_v20, %v1826_v23  ;;  %v1903_v26 = vpop.f32.mrb[1].mxu1 }
 0x234   : > { %v1940_v27 = vmax.f32 %v1932_v0, 0.0  ;;  %v1935_v6 = vadd.f32 %v1925_v20, %v1903_v26 }
 0x235   : > { %v1942_v28 = vmax.f32 %v1934_v24, 0.0  ;;  %v1941_v31 = vmax.f32 %v1933_v25, 0.0  ;;  %v1830_v32 = vpop.f32.mrb[2].mxu0 }
 0x236   : > { %1948 = vst [vmem:[%s222_s9] sm:$0xff] %v1940_v27  ;;  %v1943_v58 = vmax.f32 %v1935_v6, 0.0  ;;  %v1936_v33 = vadd.f32 %v1930_v29, %v1830_v32  ;;  %v1907_v34 = vpop.f32.mrb[2].mxu1  ;;  %v1832_v35 = vpop.f32.mrb[3].mxu0 }
 0x237   : > { %1950 = vst [vmem:[%s222_s9 + $0x10] sm:$0xff] %v1942_v28  ;;  %1949 = vst [vmem:[%s222_s9 + $0x8] sm:$0xff] %v1941_v31  ;;  %v1938_v36 = vadd.f32 %v1930_v29, %v1907_v34  ;;  %v1937_v37 = vadd.f32 %v1930_v29, %v1832_v35  ;;  %v1909_v38 = vpop.f32.mrb[3].mxu1 }
 0x238   : > { %1951 = vst [vmem:[%s222_s9 + $0x18] sm:$0xff] %v1943_v58  ;;  %v1944_v39 = vmax.f32 %v1936_v33, 0.0  ;;  %v1939_v40 = vadd.f32 %v1930_v29, %v1909_v38 }
 0x239   : > { %v1946_v41 = vmax.f32 %v1938_v36, 0.0  ;;  %v1945_v42 = vmax.f32 %v1937_v37, 0.0 }
 0x23a   : > { %1952 = vst [vmem:[%s222_s9 + $0x20] sm:$0xff] %v1944_v39  ;;  %v1947_v43 = vmax.f32 %v1939_v40, 0.0 }
 0x23b   : > { %1954 = vst [vmem:[%s222_s9 + $0x30] sm:$0xff] %v1946_v41  ;;  %1953 = vst [vmem:[%s222_s9 + $0x28] sm:$0xff] %v1945_v42 }
 0x23c   : > { %1955 = vst [vmem:[%s222_s9 + $0x38] sm:$0xff] %v1947_v43 }
 0x23d   : > { %3398 = shalt.err (!%p3395_p5)
}
 0x23e   : > { %s3399_s8 = scalar_lea.hbm %s4260_s15, 1024  ;;  %s3403_s24 = scalar_lea.hbm %s4312_s3, 2048 }
 0x23f   : > { %p3400_p9 = scmp.ne.s32.totalorder %s4260_s15, %s3399_s8  ;;  %p3404_p3 = scmp.lt.u32.totalorder %s4260_s15, %s4312_s3 }
 0x240   : > { %p3405_p7 = scmp.lt.u32.totalorder %s3403_s24, %s3399_s8  ;;  %p3407_p4 = scmp.lt.u32.totalorder %s3399_s8, %s4260_s15 }
 0x241   : > { %p3401_p1 = pnand %p3400_p9, %p3600_p10 }
 0x242   : > { %p3406_p13 = por %p3405_p7, %p3404_p3 }
 0x243   : > { %p3402_p2 = pneg %p3401_p1 }
 0x244   : > { %p3408_p6 = por %p3407_p4, %p3406_p13 }
 0x246   : > { %p3409_p8 = pnand %p3408_p6, %p3402_p2 }
 0x248   : > { %3412 = shalt.err (!%p3409_p8)
}
 0x249   : > { %s3479_s9 = smov 512   ;;  %s3480_s19 = smov 32  }
 0x24a   : > { %3254 = dma.vmem_to_hbm [thread:$0]  (%p3600_p10), %s4255_s18, 1024, %s4260_s15, %s1957_s21, %s3479_s9, %s3479_s9, %s3480_s19  }
 0x24b PF: > { %s1987_s25 = sand.u32 1, %s3451_s12   ;;  %p4332_p12 = scmp.ne.s32.totalorder %s4320_s23, 0 }
 0x24c   : > { %p4333_p11 = scmp.ge.s32.totalorder %s3471_s17, 2  ;;  %s1988_s26 = scalar_lea.sflag [#allocation4], %s1987_s25 }
 0x24e   : > { %p3265_p0 = pnand %p4333_p11, %p4332_p12 }
 0x250   : > { %3446 = dma.done.wait (!%p3265_p0), %s1988_s26, 1024  }
 0x251   : > { %3448 = vsyncadd (!%p3265_p0), %s1988_s26, 4294966272  ;;  %s20_s17 = sadd.s32 1, %s3471_s17   ;;  %s4334_s12 = smov %s3455_s13 }
 0x252   : > { %p17_p5 = scmp.ge.s32.totalorder %s20_s17, 4   ;;  %s4335_s13 = smov %s3459_s14 }
 0x253   : > { %s4336_s14 = smov %s3609_s5  ;;  %s4337_s15 = smov %s3467_s16 }
 0x254   : > { %s4338_s16 = smov %s4340_s28  ;;  %19 = sbr.rel (!%p17_p5) target bundleno = 7 (0x7), region = 87 }
 0x25b   :  { %1993 = vsyncpa [#allocation3], 1 }
 0x25c   :  { %1995 = vsyncpa [#allocation3 + $0x1], 1 }
 0x25d   :  { %1996 = vsyncpa [#allocation6], 1 }
 0x25e   :  { %1997 = vsyncpa [#allocation4], 1 }
 0x25f   :  { %1999 = vsyncpa [#allocation4 + $0x1], 1 }

</bundles_post_ra>
